<compile_context>
chip_gen: v7x
topology: tpu7x:2x2x1
jax: 0.10.0
libtpu: 0.0.40
codegen_flags: <defaults>
</compile_context>

<pallas_src>
import functools

import numpy as np
import jax
import jax.numpy as jnp
from jax.experimental import pallas as pl
from jax.experimental.pallas import tpu as pltpu


# ----------------------------------------------------------------------------
# Anchor generation (straight numpy port of the PyTorch helpers)
# ----------------------------------------------------------------------------
def generate_anchors(p_h=None, p_w=None):
    if p_h is None:
        p_h = np.array([2, 6, 10, 14])
    if p_w is None:
        p_w = np.array([2, 6, 10, 14])
    num_anchors = len(p_h) * len(p_w)
    k = 0
    anchors = np.zeros((num_anchors, 2))
    for i in range(len(p_w)):
        for j in range(len(p_h)):
            anchors[k, 1] = p_w[j]
            anchors[k, 0] = p_h[i]
            k += 1
    return anchors


def shift(shape, stride, anchor):
    shift_h = np.arange(0, shape[0]) * stride
    shift_w = np.arange(0, shape[1]) * stride
    shift_h, shift_w = np.meshgrid(shift_h, shift_w)
    shifts = np.vstack((shift_h.ravel(), shift_w.ravel())).transpose()
    A = anchor.shape[0]
    K = shifts.shape[0]
    all_anchors = anchor.reshape(1, A, 2) + shifts.reshape((1, K, 2)).transpose((1, 0, 2))
    all_anchors = all_anchors.reshape((K * A, 2))
    return all_anchors


# ----------------------------------------------------------------------------
# Pallas kernel: per-batch A2J loss (softmax over anchors + weighted sums +
# smooth-L1 losses), BN batches per grid step.
# ----------------------------------------------------------------------------
def _a2j_loss_kernel(jc_ref, off_ref, depth_ref, ann_ref, anc_ref, out_ref,
                     *, spacial_factor, block_n, num_joints):
    J = num_joints
    anc3 = anc_ref[...]                                  # (M, 3): [x, y, 1]

    # Hoisted constants (do not rebuild broadcasts inside the loop).
    lane = jax.lax.broadcasted_iota(jnp.int32, (1, 128), 1)
    row_o = jax.lax.broadcasted_iota(jnp.int32, (J, 2 * J), 0)
    col_o = jax.lax.broadcasted_iota(jnp.int32, (J, 2 * J), 1)
    mask_x = (col_o == 2 * row_o).astype(jnp.float32)        # picks off[:, j, 0]
    mask_y = (col_o == 2 * row_o + 1).astype(jnp.float32)    # picks off[:, j, 1]
    row_d = jax.lax.broadcasted_iota(jnp.int32, (J, J), 0)
    col_d = jax.lax.broadcasted_iota(jnp.int32, (J, J), 1)
    mask_diag = (row_d == col_d).astype(jnp.float32)

    def smooth_l1(d, delta):
        return jnp.where(d <= delta, (0.5 / delta) * d * d, d - 0.5 * delta)

    for b in range(block_n):
        jc = jc_ref[b]            # (M, J)
        off = off_ref[b]          # (M, 2J)  x/y interleaved along lanes
        depth = depth_ref[b]      # (M, J)
        ann = ann_ref[b]          # (J, 3)

        # Softmax over anchors (dim M), deferred normalisation.
        jc_t = jnp.transpose(jc)                        # (J, M) lane-dense
        mx = jnp.max(jc_t, axis=-1, keepdims=True)      # (J, 1)
        e = jnp.exp(jc_t - mx)                          # (J, M)

        # One MXU matmul: anchor_x / anchor_y weighted sums + softmax denom.
        s3 = jnp.dot(e, anc3, preferred_element_type=jnp.float32)   # (J, 3)
        inv_s = 1.0 / s3[:, 2:3]                                     # (J, 1)

        ann_x = ann[:, 0:1]
        ann_y = ann[:, 1:2]
        ann_z = ann[:, 2:3]

        # --- anchor (surrogate) loss: smooth-L1(delta=1)
        pa_x = s3[:, 0:1] * inv_s
        pa_y = s3[:, 1:2] * inv_s
        la = (jnp.sum(smooth_l1(jnp.abs(ann_x - pa_x), 1.0))
              + jnp.sum(smooth_l1(jnp.abs(ann_y - pa_y), 1.0)))
        anchor_loss = la / (2.0 * J)

        # --- xy regression loss: reuse pred_anchor, add softmax-weighted offsets.
        # g[j, 2j+c] = sum_m e[j, m] * off[m, 2j+c]; pick x/y entries with masks.
        g = jnp.dot(e, off, preferred_element_type=jnp.float32)      # (J, 2J)
        o_x = jnp.sum(g * mask_x, axis=-1, keepdims=True)            # (J, 1)
        o_y = jnp.sum(g * mask_y, axis=-1, keepdims=True)            # (J, 1)
        pr_x = pa_x + o_x * inv_s
        pr_y = pa_y + o_y * inv_s
        lr = (jnp.sum(smooth_l1(jnp.abs(ann_x - pr_x), 1.0))
              + jnp.sum(smooth_l1(jnp.abs(ann_y - pr_y), 1.0)))
        reg_loss = lr / (2.0 * J) * spacial_factor

        # --- depth regression loss: smooth-L1(delta=3)
        dmat = jnp.dot(e, depth, preferred_element_type=jnp.float32)  # (J, J)
        z = jnp.sum(dmat * mask_diag, axis=-1, keepdims=True) * inv_s  # (J, 1)
        lz = smooth_l1(jnp.abs(ann_z - z), 3.0)
        reg_loss = reg_loss + jnp.sum(lz) / J

        # Merged per-batch output row: lane 0 = anchor loss, lane 1 = reg loss.
        out_ref[b] = jnp.where(lane == 0, anchor_loss, reg_loss)      # (1, 128)


# ----------------------------------------------------------------------------
# Wrapper ("A2JLoss.forward")
# ----------------------------------------------------------------------------
def a2j_loss(joint_classifications, offset_regressions, depth_regressions,
             annotations, all_anchors, spacial_factor=0.1, block_n=None):
    """joint_classifications: (N, M, J); offset_regressions: (N, M, J, 2);
    depth_regressions: (N, M, J); annotations: (N, J, 3); all_anchors: (M, 2)."""
    N, M, J = joint_classifications.shape

    jc = joint_classifications.astype(jnp.float32)                    # (N, M, J)
    depth = depth_regressions.astype(jnp.float32)                     # (N, M, J)
    # Free reshape (row-major merge of the trailing dims, no data movement).
    off = offset_regressions.astype(jnp.float32).reshape(N, M, 2 * J)  # (N, M, 2J)
    ann = annotations.astype(jnp.float32)                              # (N, J, 3)
    # Constant MXU RHS folding anchor-weighted sums + softmax denominator.
    anc3 = jnp.concatenate(
        [all_anchors.astype(jnp.float32), jnp.ones((M, 1), jnp.float32)],
        axis=1)                                                        # (M, 3)

    if block_n is None:
        # VMEM-aware batch blocking: three lane-padded (M, 128) f32 tiles per
        # batch, double-buffered; stay well under the 32 MiB scoped budget so
        # the same sizing also fits v7x's 64 MiB physical VMEM.
        per_batch = 3 * (((M + 7) // 8) * 8) * 128 * 4 * 2
        budget = 20 * 1024 * 1024
        cap = int(max(1, min(8, budget // max(per_batch, 1))))
        block_n = 1
        for bn in range(1, min(N, cap) + 1):
            if N % bn == 0:
                block_n = bn
    assert N % block_n == 0

    kernel = functools.partial(
        _a2j_loss_kernel,
        spacial_factor=float(spacial_factor),
        block_n=block_n,
        num_joints=J)

    out = pl.pallas_call(
        kernel,
        out_shape=jax.ShapeDtypeStruct((N, 1, 128), jnp.float32),
        grid_spec=pltpu.PrefetchScalarGridSpec(
            num_scalar_prefetch=0,
            grid=(N // block_n,),
            in_specs=[
                pl.BlockSpec((block_n, M, J), lambda n: (n, 0, 0)),
                pl.BlockSpec((block_n, M, 2 * J), lambda n: (n, 0, 0)),
                pl.BlockSpec((block_n, M, J), lambda n: (n, 0, 0)),
                pl.BlockSpec((block_n, J, 3), lambda n: (n, 0, 0)),
                pl.BlockSpec((M, 3), lambda n: (0, 0)),
            ],
            out_specs=pl.BlockSpec((block_n, 1, 128), lambda n: (n, 0, 0)),
        ),
        compiler_params=pltpu.CompilerParams(
            dimension_semantics=("parallel",),
            vmem_limit_bytes=32 * 1024 * 1024),
    )(jc, off, depth, ann, anc3)

    anchor_loss_per_batch = out[:, 0, 0]     # (N,)
    reg_loss_per_batch = out[:, 0, 1]        # (N,)
    # matches torch.stack(...).mean(dim=0, keepdim=True) -> shape (1,)
    return (jnp.mean(anchor_loss_per_batch, keepdims=True),
            jnp.mean(reg_loss_per_batch, keepdims=True))


# ----------------------------------------------------------------------------
# Pure-JAX reference (for sanity check)
# ----------------------------------------------------------------------------
def a2j_loss_ref(jc, off, depth, ann, all_anchors, spacial_factor=0.1):
    w = jax.nn.softmax(jc, axis=1)                         # (N, M, J)
    anc = all_anchors[:, None, :]                          # (M, 1, 2)
    ann_xy = ann[:, :, :2]                                 # (N, J, 2)
    pred_a = jnp.sum(w[..., None] * anc[None], axis=1)     # (N, J, 2)
    da = jnp.abs(ann_xy - pred_a)
    la = jnp.where(da <= 1.0, 0.5 * da * da, da - 0.5)
    anchor_loss = jnp.mean(la, axis=(1, 2))                # (N,)
    xy_reg = anc[None] + off                               # (N, M, J, 2)
    pred_xy = jnp.sum(w[..., None] * xy_reg, axis=1)
    dr = jnp.abs(ann_xy - pred_xy)
    lr = jnp.where(dr <= 1.0, 0.5 * dr * dr, dr - 0.5)
    reg_loss = jnp.mean(lr, axis=(1, 2)) * spacial_factor
    pred_z = jnp.sum(w * depth, axis=1)                    # (N, J)
    dz = jnp.abs(ann[:, :, 2] - pred_z)
    lz = jnp.where(dz <= 3.0, 0.5 * (1.0 / 3.0) * dz * dz, dz - 1.5)
    reg_loss = reg_loss + jnp.mean(lz, axis=1)
    return (jnp.mean(anchor_loss, keepdims=True),
            jnp.mean(reg_loss, keepdims=True))


if __name__ == "__main__":
    # Small, deterministic configuration (stands in for const.TARGET_SIZE // 16, const.STRIDE).
    common_trunk_shape = (4, 4)   # (H, W) of the common trunk
    stride = 16
    spacial_factor = 0.1
    num_joints = 8
    batch = 2

    anchors = generate_anchors()                                  # (16, 2)
    all_anchors_np = shift(common_trunk_shape, stride, anchors)   # (M, 2), M = 4*4*16 = 256
    M = all_anchors_np.shape[0]
    all_anchors = jnp.asarray(all_anchors_np, dtype=jnp.float32)

    key = jax.random.PRNGKey(0)
    k1, k2, k3, k4 = jax.random.split(key, 4)
    joint_classifications = jax.random.normal(k1, (batch, M, num_joints), dtype=jnp.float32)
    offset_regressions = jax.random.normal(k2, (batch, M, num_joints, 2), dtype=jnp.float32)
    depth_regressions = jax.random.normal(k3, (batch, M, num_joints), dtype=jnp.float32) * 5.0
    annotations = jax.random.uniform(k4, (batch, num_joints, 3), dtype=jnp.float32,
                                     minval=0.0, maxval=64.0)

    anchor_loss, reg_loss = a2j_loss(joint_classifications, offset_regressions,
                                     depth_regressions, annotations, all_anchors,
                                     spacial_factor=spacial_factor)
    anchor_loss = jax.block_until_ready(anchor_loss)
    reg_loss = jax.block_until_ready(reg_loss)

    ref_a, ref_r = a2j_loss_ref(joint_classifications, offset_regressions,
                                depth_regressions, annotations, all_anchors,
                                spacial_factor=spacial_factor)
    np.testing.assert_allclose(np.asarray(anchor_loss), np.asarray(ref_a), rtol=1e-4, atol=1e-4)
    np.testing.assert_allclose(np.asarray(reg_loss), np.asarray(ref_r), rtol=1e-4, atol=1e-4)

    print("KERNEL_OK")
</pallas_src>

<mosaic_0001>
module attributes {stable_mosaic.version = 11 : i64} {
  func.func @_a2j_loss_kernel(%arg0: i32, %arg1: memref<2x256x8xf32, #tpu.memory_space<vmem>>, %arg2: memref<2x256x16xf32, #tpu.memory_space<vmem>>, %arg3: memref<2x256x8xf32, #tpu.memory_space<vmem>>, %arg4: memref<2x8x3xf32, #tpu.memory_space<vmem>>, %arg5: memref<256x3xf32, #tpu.memory_space<vmem>>, %arg6: memref<2x1x128xf32, #tpu.memory_space<vmem>>) attributes {dimension_semantics = [#tpu.dimension_semantics<parallel>], iteration_bounds = array<i64: 1>, scalar_prefetch = 0 : i64, scratch_operands = 0 : i64, tpu.core_type = #tpu.core_type<tc>, window_params = [{transform_indices = @transform_0, window_bounds = array<i64: 2, 256, 8>}, {transform_indices = @transform_1, window_bounds = array<i64: 2, 256, 16>}, {transform_indices = @transform_2, window_bounds = array<i64: 2, 256, 8>}, {transform_indices = @transform_3, window_bounds = array<i64: 2, 8, 3>}, {pipeline_mode = #tpu.pipeline_mode<synchronous>, transform_indices = @transform_4, window_bounds = array<i64: 256, 3>}, {transform_indices = @transform_5, window_bounds = array<i64: 2, 1, 128>}]} {
    %c0 = arith.constant 0 : index
    %c0_0 = arith.constant 0 : index
    %0 = vector.load %arg5[%c0, %c0_0] : memref<256x3xf32, #tpu.memory_space<vmem>>, vector<256x3xf32>
    %1 = tpu.iota {dimensions = array<i32: 1>} : vector<1x128xi32>
    %2 = tpu.iota {dimensions = array<i32: 0>} : vector<8x16xi32>
    %3 = tpu.iota {dimensions = array<i32: 1>} : vector<8x16xi32>
    %c2_i32 = arith.constant 2 : i32
    %4 = vector.broadcast %c2_i32 : i32 to vector<8x16xi32>
    %5 = arith.muli %4, %2 : vector<8x16xi32>
    %6 = arith.cmpi eq, %3, %5 : vector<8x16xi32>
    %7 = arith.extui %6 : vector<8x16xi1> to vector<8x16xi32>
    %8 = arith.sitofp %7 : vector<8x16xi32> to vector<8x16xf32>
    %c2_i32_1 = arith.constant 2 : i32
    %9 = vector.broadcast %c2_i32_1 : i32 to vector<8x16xi32>
    %10 = arith.muli %9, %2 : vector<8x16xi32>
    %c1_i32 = arith.constant 1 : i32
    %11 = vector.broadcast %c1_i32 : i32 to vector<8x16xi32>
    %12 = arith.addi %10, %11 : vector<8x16xi32>
    %13 = arith.cmpi eq, %3, %12 : vector<8x16xi32>
    %14 = arith.extui %13 : vector<8x16xi1> to vector<8x16xi32>
    %15 = arith.sitofp %14 : vector<8x16xi32> to vector<8x16xf32>
    %16 = tpu.iota {dimensions = array<i32: 0>} : vector<8x8xi32>
    %17 = tpu.iota {dimensions = array<i32: 1>} : vector<8x8xi32>
    %18 = arith.cmpi eq, %16, %17 : vector<8x8xi32>
    %19 = arith.extui %18 : vector<8x8xi1> to vector<8x8xi32>
    %20 = arith.sitofp %19 : vector<8x8xi32> to vector<8x8xf32>
    %c0_2 = arith.constant 0 : index
    %c0_3 = arith.constant 0 : index
    %c0_4 = arith.constant 0 : index
    %21 = vector.load %arg1[%c0_2, %c0_3, %c0_4] : memref<2x256x8xf32, #tpu.memory_space<vmem>>, vector<1x256x8xf32>
    %22 = vector.shape_cast %21 : vector<1x256x8xf32> to vector<256x8xf32>
    %c0_5 = arith.constant 0 : index
    %c0_6 = arith.constant 0 : index
    %c0_7 = arith.constant 0 : index
    %23 = vector.load %arg2[%c0_5, %c0_6, %c0_7] : memref<2x256x16xf32, #tpu.memory_space<vmem>>, vector<1x256x16xf32>
    %24 = vector.shape_cast %23 : vector<1x256x16xf32> to vector<256x16xf32>
    %c0_8 = arith.constant 0 : index
    %c0_9 = arith.constant 0 : index
    %c0_10 = arith.constant 0 : index
    %25 = vector.load %arg3[%c0_8, %c0_9, %c0_10] : memref<2x256x8xf32, #tpu.memory_space<vmem>>, vector<1x256x8xf32>
    %26 = vector.shape_cast %25 : vector<1x256x8xf32> to vector<256x8xf32>
    %c0_11 = arith.constant 0 : index
    %c0_12 = arith.constant 0 : index
    %c0_13 = arith.constant 0 : index
    %27 = vector.load %arg4[%c0_11, %c0_12, %c0_13] : memref<2x8x3xf32, #tpu.memory_space<vmem>>, vector<1x8x3xf32>
    %28 = vector.shape_cast %27 : vector<1x8x3xf32> to vector<8x3xf32>
    %29 = tpu.transpose %22, [1, 0] : vector<256x8xf32> -> vector<8x256xf32>
    %cst = arith.constant dense<0xFF800000> : vector<8xf32>
    %30 = vector.multi_reduction <maximumf>, %29, %cst [1] : vector<8x256xf32> to vector<8xf32>
    %31 = vector.shape_cast %30 : vector<8xf32> to vector<8x1xf32>
    %32 = vector.broadcast %31 : vector<8x1xf32> to vector<8x256xf32>
    %33 = arith.subf %29, %32 : vector<8x256xf32>
    %34 = math.exp %33 : vector<8x256xf32>
    %cst_14 = arith.constant dense<0.000000e+00> : vector<8x3xf32>
    %35 = tpu.matmul %34, %0, %cst_14 {dimension_numbers = #tpu.dot_dimension_numbers<[1], [0], [0], [1], [0, 0, 1, 1], [], []>} : vector<8x256xf32>, vector<256x3xf32>, vector<8x3xf32> -> vector<8x3xf32>
    %36 = vector.extract_strided_slice %35 {offsets = [0, 2], sizes = [8, 1], strides = [1, 1]} : vector<8x3xf32> to vector<8x1xf32>
    %cst_15 = arith.constant 1.000000e+00 : f32
    %37 = vector.broadcast %cst_15 : f32 to vector<8x1xf32>
    %38 = arith.divf %37, %36 : vector<8x1xf32>
    %39 = vector.extract_strided_slice %28 {offsets = [0, 0], sizes = [8, 1], strides = [1, 1]} : vector<8x3xf32> to vector<8x1xf32>
    %40 = vector.extract_strided_slice %28 {offsets = [0, 1], sizes = [8, 1], strides = [1, 1]} : vector<8x3xf32> to vector<8x1xf32>
    %41 = vector.extract_strided_slice %28 {offsets = [0, 2], sizes = [8, 1], strides = [1, 1]} : vector<8x3xf32> to vector<8x1xf32>
    %42 = vector.extract_strided_slice %35 {offsets = [0, 0], sizes = [8, 1], strides = [1, 1]} : vector<8x3xf32> to vector<8x1xf32>
    %43 = arith.mulf %42, %38 : vector<8x1xf32>
    %44 = vector.extract_strided_slice %35 {offsets = [0, 1], sizes = [8, 1], strides = [1, 1]} : vector<8x3xf32> to vector<8x1xf32>
    %45 = arith.mulf %44, %38 : vector<8x1xf32>
    %46 = arith.subf %39, %43 : vector<8x1xf32>
    %47 = math.absf %46 : vector<8x1xf32>
    %cst_16 = arith.constant 1.000000e+00 : f32
    %48 = vector.broadcast %cst_16 : f32 to vector<8x1xf32>
    %49 = arith.cmpf ole, %47, %48 : vector<8x1xf32>
    %cst_17 = arith.constant 5.000000e-01 : f32
    %50 = vector.broadcast %cst_17 : f32 to vector<8x1xf32>
    %51 = arith.mulf %50, %47 : vector<8x1xf32>
    %52 = arith.mulf %51, %47 : vector<8x1xf32>
    %cst_18 = arith.constant 5.000000e-01 : f32
    %53 = vector.broadcast %cst_18 : f32 to vector<8x1xf32>
    %54 = arith.subf %47, %53 : vector<8x1xf32>
    %55 = arith.select %49, %52, %54 : vector<8x1xi1>, vector<8x1xf32>
    %56 = vector.shape_cast %55 : vector<8x1xf32> to vector<1x8x1xf32>
    %cst_19 = arith.constant dense<0.000000e+00> : vector<1xf32>
    %57 = vector.multi_reduction <add>, %56, %cst_19 [1, 2] : vector<1x8x1xf32> to vector<1xf32>
    %58 = vector.shape_cast %57 : vector<1xf32> to vector<1x1x1xf32>
    %59 = vector.extract %58[0, 0, 0] : f32 from vector<1x1x1xf32>
    %60 = arith.subf %40, %45 : vector<8x1xf32>
    %61 = math.absf %60 : vector<8x1xf32>
    %cst_20 = arith.constant 1.000000e+00 : f32
    %62 = vector.broadcast %cst_20 : f32 to vector<8x1xf32>
    %63 = arith.cmpf ole, %61, %62 : vector<8x1xf32>
    %cst_21 = arith.constant 5.000000e-01 : f32
    %64 = vector.broadcast %cst_21 : f32 to vector<8x1xf32>
    %65 = arith.mulf %64, %61 : vector<8x1xf32>
    %66 = arith.mulf %65, %61 : vector<8x1xf32>
    %cst_22 = arith.constant 5.000000e-01 : f32
    %67 = vector.broadcast %cst_22 : f32 to vector<8x1xf32>
    %68 = arith.subf %61, %67 : vector<8x1xf32>
    %69 = arith.select %63, %66, %68 : vector<8x1xi1>, vector<8x1xf32>
    %70 = vector.shape_cast %69 : vector<8x1xf32> to vector<1x8x1xf32>
    %cst_23 = arith.constant dense<0.000000e+00> : vector<1xf32>
    %71 = vector.multi_reduction <add>, %70, %cst_23 [1, 2] : vector<1x8x1xf32> to vector<1xf32>
    %72 = vector.shape_cast %71 : vector<1xf32> to vector<1x1x1xf32>
    %73 = vector.extract %72[0, 0, 0] : f32 from vector<1x1x1xf32>
    %74 = arith.addf %59, %73 : f32
    %cst_24 = arith.constant 1.600000e+01 : f32
    %75 = arith.divf %74, %cst_24 : f32
    %cst_25 = arith.constant dense<0.000000e+00> : vector<8x16xf32>
    %76 = tpu.matmul %34, %24, %cst_25 {dimension_numbers = #tpu.dot_dimension_numbers<[1], [0], [0], [1], [0, 0, 1, 1], [], []>} : vector<8x256xf32>, vector<256x16xf32>, vector<8x16xf32> -> vector<8x16xf32>
    %77 = arith.mulf %76, %8 : vector<8x16xf32>
    %cst_26 = arith.constant dense<0.000000e+00> : vector<8xf32>
    %78 = vector.multi_reduction <add>, %77, %cst_26 [1] : vector<8x16xf32> to vector<8xf32>
    %79 = vector.shape_cast %78 : vector<8xf32> to vector<8x1xf32>
    %80 = arith.mulf %76, %15 : vector<8x16xf32>
    %cst_27 = arith.constant dense<0.000000e+00> : vector<8xf32>
    %81 = vector.multi_reduction <add>, %80, %cst_27 [1] : vector<8x16xf32> to vector<8xf32>
    %82 = vector.shape_cast %81 : vector<8xf32> to vector<8x1xf32>
    %83 = arith.mulf %79, %38 : vector<8x1xf32>
    %84 = arith.addf %43, %83 : vector<8x1xf32>
    %85 = arith.mulf %82, %38 : vector<8x1xf32>
    %86 = arith.addf %45, %85 : vector<8x1xf32>
    %87 = arith.subf %39, %84 : vector<8x1xf32>
    %88 = math.absf %87 : vector<8x1xf32>
    %cst_28 = arith.constant 1.000000e+00 : f32
    %89 = vector.broadcast %cst_28 : f32 to vector<8x1xf32>
    %90 = arith.cmpf ole, %88, %89 : vector<8x1xf32>
    %cst_29 = arith.constant 5.000000e-01 : f32
    %91 = vector.broadcast %cst_29 : f32 to vector<8x1xf32>
    %92 = arith.mulf %91, %88 : vector<8x1xf32>
    %93 = arith.mulf %92, %88 : vector<8x1xf32>
    %cst_30 = arith.constant 5.000000e-01 : f32
    %94 = vector.broadcast %cst_30 : f32 to vector<8x1xf32>
    %95 = arith.subf %88, %94 : vector<8x1xf32>
    %96 = arith.select %90, %93, %95 : vector<8x1xi1>, vector<8x1xf32>
    %97 = vector.shape_cast %96 : vector<8x1xf32> to vector<1x8x1xf32>
    %cst_31 = arith.constant dense<0.000000e+00> : vector<1xf32>
    %98 = vector.multi_reduction <add>, %97, %cst_31 [1, 2] : vector<1x8x1xf32> to vector<1xf32>
    %99 = vector.shape_cast %98 : vector<1xf32> to vector<1x1x1xf32>
    %100 = vector.extract %99[0, 0, 0] : f32 from vector<1x1x1xf32>
    %101 = arith.subf %40, %86 : vector<8x1xf32>
    %102 = math.absf %101 : vector<8x1xf32>
    %cst_32 = arith.constant 1.000000e+00 : f32
    %103 = vector.broadcast %cst_32 : f32 to vector<8x1xf32>
    %104 = arith.cmpf ole, %102, %103 : vector<8x1xf32>
    %cst_33 = arith.constant 5.000000e-01 : f32
    %105 = vector.broadcast %cst_33 : f32 to vector<8x1xf32>
    %106 = arith.mulf %105, %102 : vector<8x1xf32>
    %107 = arith.mulf %106, %102 : vector<8x1xf32>
    %cst_34 = arith.constant 5.000000e-01 : f32
    %108 = vector.broadcast %cst_34 : f32 to vector<8x1xf32>
    %109 = arith.subf %102, %108 : vector<8x1xf32>
    %110 = arith.select %104, %107, %109 : vector<8x1xi1>, vector<8x1xf32>
    %111 = vector.shape_cast %110 : vector<8x1xf32> to vector<1x8x1xf32>
    %cst_35 = arith.constant dense<0.000000e+00> : vector<1xf32>
    %112 = vector.multi_reduction <add>, %111, %cst_35 [1, 2] : vector<1x8x1xf32> to vector<1xf32>
    %113 = vector.shape_cast %112 : vector<1xf32> to vector<1x1x1xf32>
    %114 = vector.extract %113[0, 0, 0] : f32 from vector<1x1x1xf32>
    %115 = arith.addf %100, %114 : f32
    %cst_36 = arith.constant 1.600000e+01 : f32
    %116 = arith.divf %115, %cst_36 : f32
    %cst_37 = arith.constant 1.000000e-01 : f32
    %117 = arith.mulf %116, %cst_37 : f32
    %cst_38 = arith.constant dense<0.000000e+00> : vector<8x8xf32>
    %118 = tpu.matmul %34, %26, %cst_38 {dimension_numbers = #tpu.dot_dimension_numbers<[1], [0], [0], [1], [0, 0, 1, 1], [], []>} : vector<8x256xf32>, vector<256x8xf32>, vector<8x8xf32> -> vector<8x8xf32>
    %119 = arith.mulf %118, %20 : vector<8x8xf32>
    %cst_39 = arith.constant dense<0.000000e+00> : vector<8xf32>
    %120 = vector.multi_reduction <add>, %119, %cst_39 [1] : vector<8x8xf32> to vector<8xf32>
    %121 = vector.shape_cast %120 : vector<8xf32> to vector<8x1xf32>
    %122 = arith.mulf %121, %38 : vector<8x1xf32>
    %123 = arith.subf %41, %122 : vector<8x1xf32>
    %124 = math.absf %123 : vector<8x1xf32>
    %cst_40 = arith.constant 3.000000e+00 : f32
    %125 = vector.broadcast %cst_40 : f32 to vector<8x1xf32>
    %126 = arith.cmpf ole, %124, %125 : vector<8x1xf32>
    %cst_41 = arith.constant 0.166666672 : f32
    %127 = vector.broadcast %cst_41 : f32 to vector<8x1xf32>
    %128 = arith.mulf %127, %124 : vector<8x1xf32>
    %129 = arith.mulf %128, %124 : vector<8x1xf32>
    %cst_42 = arith.constant 1.500000e+00 : f32
    %130 = vector.broadcast %cst_42 : f32 to vector<8x1xf32>
    %131 = arith.subf %124, %130 : vector<8x1xf32>
    %132 = arith.select %126, %129, %131 : vector<8x1xi1>, vector<8x1xf32>
    %133 = vector.shape_cast %132 : vector<8x1xf32> to vector<1x8x1xf32>
    %cst_43 = arith.constant dense<0.000000e+00> : vector<1xf32>
    %134 = vector.multi_reduction <add>, %133, %cst_43 [1, 2] : vector<1x8x1xf32> to vector<1xf32>
    %135 = vector.shape_cast %134 : vector<1xf32> to vector<1x1x1xf32>
    %136 = vector.extract %135[0, 0, 0] : f32 from vector<1x1x1xf32>
    %cst_44 = arith.constant 8.000000e+00 : f32
    %137 = arith.divf %136, %cst_44 : f32
    %138 = arith.addf %117, %137 : f32
    %c0_i32 = arith.constant 0 : i32
    %139 = vector.broadcast %c0_i32 : i32 to vector<1x128xi32>
    %140 = arith.cmpi eq, %1, %139 : vector<1x128xi32>
    %141 = vector.broadcast %75 : f32 to vector<1x128xf32>
    %142 = vector.broadcast %138 : f32 to vector<1x128xf32>
    %143 = arith.select %140, %141, %142 : vector<1x128xi1>, vector<1x128xf32>
    %c0_45 = arith.constant 0 : index
    %c0_46 = arith.constant 0 : index
    %c0_47 = arith.constant 0 : index
    %144 = vector.load %arg6[%c0_45, %c0_46, %c0_47] : memref<2x1x128xf32, #tpu.memory_space<vmem>>, vector<1x1x128xf32>
    %145 = vector.shape_cast %144 : vector<1x1x128xf32> to vector<1x128xf32>
    %146 = vector.shape_cast %143 : vector<1x128xf32> to vector<1x1x128xf32>
    tpu.vector_store %arg6[%c0_45, %c0_46, %c0_47], %146 {strides = array<i32>} : memref<2x1x128xf32, #tpu.memory_space<vmem>>, vector<1x1x128xf32>,
    %c1 = arith.constant 1 : index
    %c0_48 = arith.constant 0 : index
    %c0_49 = arith.constant 0 : index
    %147 = vector.load %arg1[%c1, %c0_48, %c0_49] : memref<2x256x8xf32, #tpu.memory_space<vmem>>, vector<1x256x8xf32>
    %148 = vector.shape_cast %147 : vector<1x256x8xf32> to vector<256x8xf32>
    %c1_50 = arith.constant 1 : index
    %c0_51 = arith.constant 0 : index
    %c0_52 = arith.constant 0 : index
    %149 = vector.load %arg2[%c1_50, %c0_51, %c0_52] : memref<2x256x16xf32, #tpu.memory_space<vmem>>, vector<1x256x16xf32>
    %150 = vector.shape_cast %149 : vector<1x256x16xf32> to vector<256x16xf32>
    %c1_53 = arith.constant 1 : index
    %c0_54 = arith.constant 0 : index
    %c0_55 = arith.constant 0 : index
    %151 = vector.load %arg3[%c1_53, %c0_54, %c0_55] : memref<2x256x8xf32, #tpu.memory_space<vmem>>, vector<1x256x8xf32>
    %152 = vector.shape_cast %151 : vector<1x256x8xf32> to vector<256x8xf32>
    %c1_56 = arith.constant 1 : index
    %c0_57 = arith.constant 0 : index
    %c0_58 = arith.constant 0 : index
    %153 = vector.load %arg4[%c1_56, %c0_57, %c0_58] : memref<2x8x3xf32, #tpu.memory_space<vmem>>, vector<1x8x3xf32>
    %154 = vector.shape_cast %153 : vector<1x8x3xf32> to vector<8x3xf32>
    %155 = tpu.transpose %148, [1, 0] : vector<256x8xf32> -> vector<8x256xf32>
    %cst_59 = arith.constant dense<0xFF800000> : vector<8xf32>
    %156 = vector.multi_reduction <maximumf>, %155, %cst_59 [1] : vector<8x256xf32> to vector<8xf32>
    %157 = vector.shape_cast %156 : vector<8xf32> to vector<8x1xf32>
    %158 = vector.broadcast %157 : vector<8x1xf32> to vector<8x256xf32>
    %159 = arith.subf %155, %158 : vector<8x256xf32>
    %160 = math.exp %159 : vector<8x256xf32>
    %cst_60 = arith.constant dense<0.000000e+00> : vector<8x3xf32>
    %161 = tpu.matmul %160, %0, %cst_60 {dimension_numbers = #tpu.dot_dimension_numbers<[1], [0], [0], [1], [0, 0, 1, 1], [], []>} : vector<8x256xf32>, vector<256x3xf32>, vector<8x3xf32> -> vector<8x3xf32>
    %162 = vector.extract_strided_slice %161 {offsets = [0, 2], sizes = [8, 1], strides = [1, 1]} : vector<8x3xf32> to vector<8x1xf32>
    %cst_61 = arith.constant 1.000000e+00 : f32
    %163 = vector.broadcast %cst_61 : f32 to vector<8x1xf32>
    %164 = arith.divf %163, %162 : vector<8x1xf32>
    %165 = vector.extract_strided_slice %154 {offsets = [0, 0], sizes = [8, 1], strides = [1, 1]} : vector<8x3xf32> to vector<8x1xf32>
    %166 = vector.extract_strided_slice %154 {offsets = [0, 1], sizes = [8, 1], strides = [1, 1]} : vector<8x3xf32> to vector<8x1xf32>
    %167 = vector.extract_strided_slice %154 {offsets = [0, 2], sizes = [8, 1], strides = [1, 1]} : vector<8x3xf32> to vector<8x1xf32>
    %168 = vector.extract_strided_slice %161 {offsets = [0, 0], sizes = [8, 1], strides = [1, 1]} : vector<8x3xf32> to vector<8x1xf32>
    %169 = arith.mulf %168, %164 : vector<8x1xf32>
    %170 = vector.extract_strided_slice %161 {offsets = [0, 1], sizes = [8, 1], strides = [1, 1]} : vector<8x3xf32> to vector<8x1xf32>
    %171 = arith.mulf %170, %164 : vector<8x1xf32>
    %172 = arith.subf %165, %169 : vector<8x1xf32>
    %173 = math.absf %172 : vector<8x1xf32>
    %cst_62 = arith.constant 1.000000e+00 : f32
    %174 = vector.broadcast %cst_62 : f32 to vector<8x1xf32>
    %175 = arith.cmpf ole, %173, %174 : vector<8x1xf32>
    %cst_63 = arith.constant 5.000000e-01 : f32
    %176 = vector.broadcast %cst_63 : f32 to vector<8x1xf32>
    %177 = arith.mulf %176, %173 : vector<8x1xf32>
    %178 = arith.mulf %177, %173 : vector<8x1xf32>
    %cst_64 = arith.constant 5.000000e-01 : f32
    %179 = vector.broadcast %cst_64 : f32 to vector<8x1xf32>
    %180 = arith.subf %173, %179 : vector<8x1xf32>
    %181 = arith.select %175, %178, %180 : vector<8x1xi1>, vector<8x1xf32>
    %182 = vector.shape_cast %181 : vector<8x1xf32> to vector<1x8x1xf32>
    %cst_65 = arith.constant dense<0.000000e+00> : vector<1xf32>
    %183 = vector.multi_reduction <add>, %182, %cst_65 [1, 2] : vector<1x8x1xf32> to vector<1xf32>
    %184 = vector.shape_cast %183 : vector<1xf32> to vector<1x1x1xf32>
    %185 = vector.extract %184[0, 0, 0] : f32 from vector<1x1x1xf32>
    %186 = arith.subf %166, %171 : vector<8x1xf32>
    %187 = math.absf %186 : vector<8x1xf32>
    %cst_66 = arith.constant 1.000000e+00 : f32
    %188 = vector.broadcast %cst_66 : f32 to vector<8x1xf32>
    %189 = arith.cmpf ole, %187, %188 : vector<8x1xf32>
    %cst_67 = arith.constant 5.000000e-01 : f32
    %190 = vector.broadcast %cst_67 : f32 to vector<8x1xf32>
    %191 = arith.mulf %190, %187 : vector<8x1xf32>
    %192 = arith.mulf %191, %187 : vector<8x1xf32>
    %cst_68 = arith.constant 5.000000e-01 : f32
    %193 = vector.broadcast %cst_68 : f32 to vector<8x1xf32>
    %194 = arith.subf %187, %193 : vector<8x1xf32>
    %195 = arith.select %189, %192, %194 : vector<8x1xi1>, vector<8x1xf32>
    %196 = vector.shape_cast %195 : vector<8x1xf32> to vector<1x8x1xf32>
    %cst_69 = arith.constant dense<0.000000e+00> : vector<1xf32>
    %197 = vector.multi_reduction <add>, %196, %cst_69 [1, 2] : vector<1x8x1xf32> to vector<1xf32>
    %198 = vector.shape_cast %197 : vector<1xf32> to vector<1x1x1xf32>
    %199 = vector.extract %198[0, 0, 0] : f32 from vector<1x1x1xf32>
    %200 = arith.addf %185, %199 : f32
    %cst_70 = arith.constant 1.600000e+01 : f32
    %201 = arith.divf %200, %cst_70 : f32
    %cst_71 = arith.constant dense<0.000000e+00> : vector<8x16xf32>
    %202 = tpu.matmul %160, %150, %cst_71 {dimension_numbers = #tpu.dot_dimension_numbers<[1], [0], [0], [1], [0, 0, 1, 1], [], []>} : vector<8x256xf32>, vector<256x16xf32>, vector<8x16xf32> -> vector<8x16xf32>
    %203 = arith.mulf %202, %8 : vector<8x16xf32>
    %cst_72 = arith.constant dense<0.000000e+00> : vector<8xf32>
    %204 = vector.multi_reduction <add>, %203, %cst_72 [1] : vector<8x16xf32> to vector<8xf32>
    %205 = vector.shape_cast %204 : vector<8xf32> to vector<8x1xf32>
    %206 = arith.mulf %202, %15 : vector<8x16xf32>
    %cst_73 = arith.constant dense<0.000000e+00> : vector<8xf32>
    %207 = vector.multi_reduction <add>, %206, %cst_73 [1] : vector<8x16xf32> to vector<8xf32>
    %208 = vector.shape_cast %207 : vector<8xf32> to vector<8x1xf32>
    %209 = arith.mulf %205, %164 : vector<8x1xf32>
    %210 = arith.addf %169, %209 : vector<8x1xf32>
    %211 = arith.mulf %208, %164 : vector<8x1xf32>
    %212 = arith.addf %171, %211 : vector<8x1xf32>
    %213 = arith.subf %165, %210 : vector<8x1xf32>
    %214 = math.absf %213 : vector<8x1xf32>
    %cst_74 = arith.constant 1.000000e+00 : f32
    %215 = vector.broadcast %cst_74 : f32 to vector<8x1xf32>
    %216 = arith.cmpf ole, %214, %215 : vector<8x1xf32>
    %cst_75 = arith.constant 5.000000e-01 : f32
    %217 = vector.broadcast %cst_75 : f32 to vector<8x1xf32>
    %218 = arith.mulf %217, %214 : vector<8x1xf32>
    %219 = arith.mulf %218, %214 : vector<8x1xf32>
    %cst_76 = arith.constant 5.000000e-01 : f32
    %220 = vector.broadcast %cst_76 : f32 to vector<8x1xf32>
    %221 = arith.subf %214, %220 : vector<8x1xf32>
    %222 = arith.select %216, %219, %221 : vector<8x1xi1>, vector<8x1xf32>
    %223 = vector.shape_cast %222 : vector<8x1xf32> to vector<1x8x1xf32>
    %cst_77 = arith.constant dense<0.000000e+00> : vector<1xf32>
    %224 = vector.multi_reduction <add>, %223, %cst_77 [1, 2] : vector<1x8x1xf32> to vector<1xf32>
    %225 = vector.shape_cast %224 : vector<1xf32> to vector<1x1x1xf32>
    %226 = vector.extract %225[0, 0, 0] : f32 from vector<1x1x1xf32>
    %227 = arith.subf %166, %212 : vector<8x1xf32>
    %228 = math.absf %227 : vector<8x1xf32>
    %cst_78 = arith.constant 1.000000e+00 : f32
    %229 = vector.broadcast %cst_78 : f32 to vector<8x1xf32>
    %230 = arith.cmpf ole, %228, %229 : vector<8x1xf32>
    %cst_79 = arith.constant 5.000000e-01 : f32
    %231 = vector.broadcast %cst_79 : f32 to vector<8x1xf32>
    %232 = arith.mulf %231, %228 : vector<8x1xf32>
    %233 = arith.mulf %232, %228 : vector<8x1xf32>
    %cst_80 = arith.constant 5.000000e-01 : f32
    %234 = vector.broadcast %cst_80 : f32 to vector<8x1xf32>
    %235 = arith.subf %228, %234 : vector<8x1xf32>
    %236 = arith.select %230, %233, %235 : vector<8x1xi1>, vector<8x1xf32>
    %237 = vector.shape_cast %236 : vector<8x1xf32> to vector<1x8x1xf32>
    %cst_81 = arith.constant dense<0.000000e+00> : vector<1xf32>
    %238 = vector.multi_reduction <add>, %237, %cst_81 [1, 2] : vector<1x8x1xf32> to vector<1xf32>
    %239 = vector.shape_cast %238 : vector<1xf32> to vector<1x1x1xf32>
    %240 = vector.extract %239[0, 0, 0] : f32 from vector<1x1x1xf32>
    %241 = arith.addf %226, %240 : f32
    %cst_82 = arith.constant 1.600000e+01 : f32
    %242 = arith.divf %241, %cst_82 : f32
    %cst_83 = arith.constant 1.000000e-01 : f32
    %243 = arith.mulf %242, %cst_83 : f32
    %cst_84 = arith.constant dense<0.000000e+00> : vector<8x8xf32>
    %244 = tpu.matmul %160, %152, %cst_84 {dimension_numbers = #tpu.dot_dimension_numbers<[1], [0], [0], [1], [0, 0, 1, 1], [], []>} : vector<8x256xf32>, vector<256x8xf32>, vector<8x8xf32> -> vector<8x8xf32>
    %245 = arith.mulf %244, %20 : vector<8x8xf32>
    %cst_85 = arith.constant dense<0.000000e+00> : vector<8xf32>
    %246 = vector.multi_reduction <add>, %245, %cst_85 [1] : vector<8x8xf32> to vector<8xf32>
    %247 = vector.shape_cast %246 : vector<8xf32> to vector<8x1xf32>
    %248 = arith.mulf %247, %164 : vector<8x1xf32>
    %249 = arith.subf %167, %248 : vector<8x1xf32>
    %250 = math.absf %249 : vector<8x1xf32>
    %cst_86 = arith.constant 3.000000e+00 : f32
    %251 = vector.broadcast %cst_86 : f32 to vector<8x1xf32>
    %252 = arith.cmpf ole, %250, %251 : vector<8x1xf32>
    %cst_87 = arith.constant 0.166666672 : f32
    %253 = vector.broadcast %cst_87 : f32 to vector<8x1xf32>
    %254 = arith.mulf %253, %250 : vector<8x1xf32>
    %255 = arith.mulf %254, %250 : vector<8x1xf32>
    %cst_88 = arith.constant 1.500000e+00 : f32
    %256 = vector.broadcast %cst_88 : f32 to vector<8x1xf32>
    %257 = arith.subf %250, %256 : vector<8x1xf32>
    %258 = arith.select %252, %255, %257 : vector<8x1xi1>, vector<8x1xf32>
    %259 = vector.shape_cast %258 : vector<8x1xf32> to vector<1x8x1xf32>
    %cst_89 = arith.constant dense<0.000000e+00> : vector<1xf32>
    %260 = vector.multi_reduction <add>, %259, %cst_89 [1, 2] : vector<1x8x1xf32> to vector<1xf32>
    %261 = vector.shape_cast %260 : vector<1xf32> to vector<1x1x1xf32>
    %262 = vector.extract %261[0, 0, 0] : f32 from vector<1x1x1xf32>
    %cst_90 = arith.constant 8.000000e+00 : f32
    %263 = arith.divf %262, %cst_90 : f32
    %264 = arith.addf %243, %263 : f32
    %c0_i32_91 = arith.constant 0 : i32
    %265 = vector.broadcast %c0_i32_91 : i32 to vector<1x128xi32>
    %266 = arith.cmpi eq, %1, %265 : vector<1x128xi32>
    %267 = vector.broadcast %201 : f32 to vector<1x128xf32>
    %268 = vector.broadcast %264 : f32 to vector<1x128xf32>
    %269 = arith.select %266, %267, %268 : vector<1x128xi1>, vector<1x128xf32>
    %c1_92 = arith.constant 1 : index
    %c0_93 = arith.constant 0 : index
    %c0_94 = arith.constant 0 : index
    %270 = vector.load %arg6[%c1_92, %c0_93, %c0_94] : memref<2x1x128xf32, #tpu.memory_space<vmem>>, vector<1x1x128xf32>
    %271 = vector.shape_cast %270 : vector<1x1x128xf32> to vector<1x128xf32>
    %272 = vector.shape_cast %269 : vector<1x128xf32> to vector<1x1x128xf32>
    tpu.vector_store %arg6[%c1_92, %c0_93, %c0_94], %272 {strides = array<i32>} : memref<2x1x128xf32, #tpu.memory_space<vmem>>, vector<1x1x128xf32>,
    return
  }
  func.func @transform_0(%arg0: i32) -> (i32, i32, i32) {
    %c0_i32 = arith.constant 0 : i32
    %c0_i32_0 = arith.constant 0 : i32
    %c0_i32_1 = arith.constant 0 : i32
    return %arg0, %c0_i32, %c0_i32_0 : i32, i32, i32
  }
  func.func @transform_1(%arg0: i32) -> (i32, i32, i32) {
    %c0_i32 = arith.constant 0 : i32
    %c0_i32_0 = arith.constant 0 : i32
    %c0_i32_1 = arith.constant 0 : i32
    return %arg0, %c0_i32, %c0_i32_0 : i32, i32, i32
  }
  func.func @transform_2(%arg0: i32) -> (i32, i32, i32) {
    %c0_i32 = arith.constant 0 : i32
    %c0_i32_0 = arith.constant 0 : i32
    %c0_i32_1 = arith.constant 0 : i32
    return %arg0, %c0_i32, %c0_i32_0 : i32, i32, i32
  }
  func.func @transform_3(%arg0: i32) -> (i32, i32, i32) {
    %c0_i32 = arith.constant 0 : i32
    %c0_i32_0 = arith.constant 0 : i32
    %c0_i32_1 = arith.constant 0 : i32
    return %arg0, %c0_i32, %c0_i32_0 : i32, i32, i32
  }
  func.func @transform_4(%arg0: i32) -> (i32, i32) {
    %c0_i32 = arith.constant 0 : i32
    %c0_i32_0 = arith.constant 0 : i32
    %c0_i32_1 = arith.constant 0 : i32
    return %c0_i32, %c0_i32_0 : i32, i32
  }
  func.func @transform_5(%arg0: i32) -> (i32, i32, i32) {
    %c0_i32 = arith.constant 0 : i32
    %c0_i32_0 = arith.constant 0 : i32
    %c0_i32_1 = arith.constant 0 : i32
    return %arg0, %c0_i32, %c0_i32_0 : i32, i32, i32
  }
}

</mosaic_0001>

<bundles_post_ra>
// kernel: tpu_custom_call.1
= control target key start
LH: loop header
LB: loop body
LE: loop exit
PB: predicated region body
PF: predicated region fallthrough
CT: control target
= control target key end

     0   :  { %s2620_s0 = inlined_call_operand.vmem [shape: f32[2,256,8], index: 0, kind: input, shape index: {}]   ;;  %s2621_s1 = inlined_call_operand.vmem [shape: f32[2,256,16], index: 1, kind: input, shape index: {}]   ;;  %s2622_s2 = inlined_call_operand.vmem [shape: f32[2,256,8], index: 2, kind: input, shape index: {}]   ;;  %s2623_s3 = inlined_call_operand.vmem [shape: f32[2,8,3], index: 3, kind: input, shape index: {}]   ;;  %s2624_s4 = inlined_call_operand.vmem [shape: f32[256,3], index: 4, kind: input, shape index: {}]   ;;  %s2625_s5 = inlined_call_operand.hbm [shape: f32[2,1,128], index: 5, kind: output, shape index: {}]  }
   0x1   :  { %v84_v0 = vld [vmem:[%s2620_s0 + $0x80] sm:$0xff]  ;;  %v85_v2 = vld [vmem:[%s2620_s0 + $0x88] sm:$0xff]  ;;  %v86_v4 = vld [vmem:[%s2620_s0 + $0x90] sm:$0xff] }
   0x2   :  { %v68_v1 = vld [vmem:[%s2620_s0] sm:$0xff]  ;;  %197 = vxpose.xlu1.b32.start [1/16] (narrow) %v84_v0, 8  ;;  %v69_v3 = vld [vmem:[%s2620_s0 + $0x8] sm:$0xff]  ;;  %v70_v5 = vld [vmem:[%s2620_s0 + $0x10] sm:$0xff] }
   0x3   :  { %165 = vxpose.xlu0.b32.start [1/16] (narrow) %v68_v1, 8  ;;  %v87_v6 = vld [vmem:[%s2620_s0 + $0x98] sm:$0xff] }
   0x4   :  { %v71_v7 = vld [vmem:[%s2620_s0 + $0x18] sm:$0xff] }
   0x6   :  { %198 = vxpose.xlu1.b32.cont [2/16] (narrow) %v85_v2, 8 }
   0x7   :  { %166 = vxpose.xlu0.b32.cont [2/16] (narrow) %v69_v3, 8 }
   0xa   :  { %199 = vxpose.xlu1.b32.cont [3/16] (narrow) %v86_v4, 8 }
   0xb   :  { %167 = vxpose.xlu0.b32.cont [3/16] (narrow) %v70_v5, 8 }
   0xc   :  { %10 = vsyncpa [#allocation3], 0  ;;  %v88_v8 = vld [vmem:[%s2620_s0 + $0xa0] sm:$0xff]  ;;  %v89_v10 = vld [vmem:[%s2620_s0 + $0xa8] sm:$0xff]  ;;  %vm433_vm2 = vcmask 130048   ;;  %vm567_vm4 = vcmask 64512  }
   0xd   :  { %v72_v9 = vld [vmem:[%s2620_s0 + $0x20] sm:$0xff]  ;;  %v73_v11 = vld [vmem:[%s2620_s0 + $0x28] sm:$0xff]  ;;  %v90_v12 = vld [vmem:[%s2620_s0 + $0xb0] sm:$0xff]  ;;  %vm326_vm11 = vcmask 7168   ;;  %s1730_s22 = smov [#allocation2]  }
   0xe   :  { %200 = vxpose.xlu1.b32.cont [4/16] (narrow) %v87_v6, 8  ;;  %v74_v13 = vld [vmem:[%s2620_s0 + $0x30] sm:$0xff]  ;;  %v91_v14 = vld [vmem:[%s2620_s0 + $0xb8] sm:$0xff]  ;;  %v92_v16 = vld [vmem:[%s2620_s0 + $0xc0] sm:$0xff] }
   0xf   :  { %168 = vxpose.xlu0.b32.cont [4/16] (narrow) %v71_v7, 8  ;;  %v75_v15 = vld [vmem:[%s2620_s0 + $0x38] sm:$0xff]  ;;  %v76_v17 = vld [vmem:[%s2620_s0 + $0x40] sm:$0xff]  ;;  %v93_v18 = vld [vmem:[%s2620_s0 + $0xc8] sm:$0xff] }
  0x10   :  { %v77_v19 = vld [vmem:[%s2620_s0 + $0x48] sm:$0xff]  ;;  %v94_v20 = vld [vmem:[%s2620_s0 + $0xd0] sm:$0xff]  ;;  %v95_v22 = vld [vmem:[%s2620_s0 + $0xd8] sm:$0xff] }
  0x11   :  { %v78_v21 = vld [vmem:[%s2620_s0 + $0x50] sm:$0xff]  ;;  %v79_v23 = vld [vmem:[%s2620_s0 + $0x58] sm:$0xff]  ;;  %v96_v24 = vld [vmem:[%s2620_s0 + $0xe0] sm:$0xff] }
  0x12   :  { %201 = vxpose.xlu1.b32.cont [5/16] (narrow) %v88_v8, 8  ;;  %v80_v25 = vld [vmem:[%s2620_s0 + $0x60] sm:$0xff]  ;;  %v97_v26 = vld [vmem:[%s2620_s0 + $0xe8] sm:$0xff]  ;;  %v98_v28 = vld [vmem:[%s2620_s0 + $0xf0] sm:$0xff] }
  0x13   :  { %169 = vxpose.xlu0.b32.cont [5/16] (narrow) %v72_v9, 8  ;;  %v81_v27 = vld [vmem:[%s2620_s0 + $0x68] sm:$0xff]  ;;  %v82_v29 = vld [vmem:[%s2620_s0 + $0x70] sm:$0xff]  ;;  %v99_v30 = vld [vmem:[%s2620_s0 + $0xf8] sm:$0xff] }
  0x14   :  { %v83_v31 = vld [vmem:[%s2620_s0 + $0x78] sm:$0xff]  ;;  %v1161_v32 = vld [vmem:[%s2620_s0 + $0x100] sm:$0xff]  ;;  %v1162_v33 = vld [vmem:[%s2620_s0 + $0x108] sm:$0xff] }
  0x15   :  { %v1163_v34 = vld [vmem:[%s2620_s0 + $0x110] sm:$0xff]  ;;  %v1164_v35 = vld [vmem:[%s2620_s0 + $0x118] sm:$0xff]  ;;  %v1165_v36 = vld [vmem:[%s2620_s0 + $0x120] sm:$0xff] }
  0x16   :  { %202 = vxpose.xlu1.b32.cont [6/16] (narrow) %v89_v10, 8  ;;  %v1166_v37 = vld [vmem:[%s2620_s0 + $0x128] sm:$0xff]  ;;  %v1167_v38 = vld [vmem:[%s2620_s0 + $0x130] sm:$0xff]  ;;  %v1168_v39 = vld [vmem:[%s2620_s0 + $0x138] sm:$0xff] }
  0x17   :  { %170 = vxpose.xlu0.b32.cont [6/16] (narrow) %v73_v11, 8  ;;  %v1169_v40 = vld [vmem:[%s2620_s0 + $0x140] sm:$0xff]  ;;  %v1170_v41 = vld [vmem:[%s2620_s0 + $0x148] sm:$0xff]  ;;  %v1171_v42 = vld [vmem:[%s2620_s0 + $0x150] sm:$0xff] }
  0x18   :  { %v1172_v43 = vld [vmem:[%s2620_s0 + $0x158] sm:$0xff]  ;;  %v1173_v44 = vld [vmem:[%s2620_s0 + $0x160] sm:$0xff]  ;;  %v38_v46 = vld [vmem:[%s2624_s4 + $0x88] sm:$0xff] }
  0x19   :  { %v37_v45 = vld [vmem:[%s2624_s4 + $0x80] sm:$0xff]  ;;  %v22_v49 = vld [vmem:[%s2624_s4 + $0x8] sm:$0xff]  ;;  %v39_v56 = vld [vmem:[%s2624_s4 + $0x90] sm:$0xff] }
  0x1a   :  { %203 = vxpose.xlu1.b32.cont [7/16] (narrow) %v90_v12, 8  ;;  %v21_v47 = vld [vmem:[%s2624_s4] sm:$0xff]  ;;  %v1907_v48 = vpack.c.bf16 %v38_v46, %v37_v45  ;;  %v117_v51 = vld [vmem:[%s2621_s1 + $0x88] sm:$0xff]  ;;  %v40_v59 = vld [vmem:[%s2624_s4 + $0x98] sm:$0xff] }
  0x1b   :  { %171 = vxpose.xlu0.b32.cont [7/16] (narrow) %v74_v13, 8  ;;  %v116_v50 = vld [vmem:[%s2621_s1 + $0x80] sm:$0xff]  ;;  %v1918_v52 = vpack.c.bf16 %v22_v49, %v21_v47  ;;  %v101_v55 = vld [vmem:[%s2621_s1 + $0x8] sm:$0xff]  ;;  %v23_v60 = vld [vmem:[%s2624_s4 + $0x10] sm:$0xff]  ;;  %v1943_v62 = vpack.c.bf16 %v40_v59, %v39_v56 }
  0x1c   :  { %v1505_v53 = vpack.c.bf16 %v117_v51, %v116_v50  ;;  %v100_v54 = vld [vmem:[%s2621_s1] sm:$0xff]  ;;  %v1174_v57 = vld [vmem:[%s2620_s0 + $0x168] sm:$0xff]  ;;  %1474 = vmatprep.subr.bf16.mxu0 %v1907_v48  ;;  %v24_v61 = vld [vmem:[%s2624_s4 + $0x18] sm:$0xff] }
  0x1d   :  { %v1507_v58 = vpack.c.bf16 %v101_v55, %v100_v54  ;;  %1476 = vmatpush3.bf16.msra.mxu0 %v1918_v52  ;;  %v1945_v63 = vpack.c.bf16 %v24_v61, %v23_v60  ;;  %v118_v0 = vld [vmem:[%s2621_s1 + $0x90] sm:$0xff]  ;;  %v119_v1 = vld [vmem:[%s2621_s1 + $0x98] sm:$0xff]  ;;  %v41_v5 = vld [vmem:[%s2624_s4 + $0xa0] sm:$0xff] }
  0x1e   :  { %204 = vxpose.xlu1.b32.cont [8/16] (narrow) %v91_v14, 8  ;;  %v102_v2 = vld [vmem:[%s2621_s1 + $0x10] sm:$0xff]  ;;  %1506 = vmatprep.subr.bf16.mxu1 %v1505_v53  ;;  %v1509_v3 = vpack.c.bf16 %v119_v1, %v118_v0  ;;  %v103_v4 = vld [vmem:[%s2621_s1 + $0x18] sm:$0xff]  ;;  %v42_v6 = vld [vmem:[%s2624_s4 + $0xa8] sm:$0xff] }
  0x1f   :  { %172 = vxpose.xlu0.b32.cont [8/16] (narrow) %v75_v15, 8  ;;  %1508 = vmatpush3.bf16.msra.mxu1 %v1507_v58  ;;  %v1511_v7 = vpack.c.bf16 %v103_v4, %v102_v2  ;;  %v1966_v8 = vpack.c.bf16 %v42_v6, %v41_v5  ;;  %v25_v9 = vld [vmem:[%s2624_s4 + $0x20] sm:$0xff]  ;;  %v26_v10 = vld [vmem:[%s2624_s4 + $0x28] sm:$0xff]  ;;  %v1175_v12 = vld [vmem:[%s2620_s0 + $0x170] sm:$0xff] }
  0x20   :  { %1478 = vmatprep.subr.bf16.mxu0 %v1943_v62  ;;  %v120_v11 = vld [vmem:[%s2621_s1 + $0xa0] sm:$0xff]  ;;  %1510 = vmatprep.subr.bf16.mxu1 %v1509_v3  ;;  %v121_v13 = vld [vmem:[%s2621_s1 + $0xa8] sm:$0xff]  ;;  %v47_v47 = vld [vmem:[%s2624_s4 + $0xd0] sm:$0xff] }
  0x21   :  { %v104_v14 = vld [vmem:[%s2621_s1 + $0x20] sm:$0xff]  ;;  %v105_v15 = vld [vmem:[%s2621_s1 + $0x28] sm:$0xff]  ;;  %1480 = vmatpush3.bf16.msra.mxu0 %v1945_v63  ;;  %v48_v49 = vld [vmem:[%s2624_s4 + $0xd8] sm:$0xff] }
  0x22   :  { %205 = vxpose.xlu1.b32.cont [9/16] (narrow) %v92_v16, 8  ;;  %v1990_v16 = vpack.c.bf16 %v26_v10, %v25_v9  ;;  %1482 = vmatprep.subr.bf16.mxu0 %v1966_v8  ;;  %v2069_v50 = vpack.c.bf16 %v48_v49, %v47_v47  ;;  %v31_v51 = vld [vmem:[%s2624_s4 + $0x50] sm:$0xff]  ;;  %v32_v53 = vld [vmem:[%s2624_s4 + $0x58] sm:$0xff]  ;;  %v49_v61 = vld [vmem:[%s2624_s4 + $0xe0] sm:$0xff] }
  0x23   :  { %173 = vxpose.xlu0.b32.cont [9/16] (narrow) %v76_v17, 8  ;;  %v1513_v17 = vpack.c.bf16 %v121_v13, %v120_v11  ;;  %1512 = vmatpush3.bf16.msra.mxu1 %v1511_v7  ;;  %v126_v54 = vld [vmem:[%s2621_s1 + $0xd0] sm:$0xff]  ;;  %v2080_v55 = vpack.c.bf16 %v32_v53, %v31_v51  ;;  %v127_v56 = vld [vmem:[%s2621_s1 + $0xd8] sm:$0xff]  ;;  %v50_v0 = vld [vmem:[%s2624_s4 + $0xe8] sm:$0xff] }
  0x24   :  { %v111_v58 = vld [vmem:[%s2621_s1 + $0x58] sm:$0xff]  ;;  %v1525_v59 = vpack.c.bf16 %v127_v56, %v126_v54  ;;  %v33_v1 = vld [vmem:[%s2624_s4 + $0x60] sm:$0xff]  ;;  %v2102_v2 = vpack.c.bf16 %v50_v0, %v49_v61  ;;  %v34_v3 = vld [vmem:[%s2624_s4 + $0x68] sm:$0xff] }
  0x25   :  { %1514 = vmatprep.subr.bf16.mxu1 %v1513_v17  ;;  %1484 = vmatpush3.bf16.msra.mxu0 %v1990_v16  ;;  %v128_v4 = vld [vmem:[%s2621_s1 + $0xe0] sm:$0xff]  ;;  %v129_v5 = vld [vmem:[%s2621_s1 + $0xe8] sm:$0xff]  ;;  %v2113_v6 = vpack.c.bf16 %v34_v3, %v33_v1  ;;  %v51_v11 = vld [vmem:[%s2624_s4 + $0xf0] sm:$0xff] }
  0x26   :  { %206 = vxpose.xlu1.b32.cont [10/16] (narrow) %v93_v18, 8  ;;  %v43_v18 = vld [vmem:[%s2624_s4 + $0xb0] sm:$0xff]  ;;  %v1529_v7 = vpack.c.bf16 %v129_v5, %v128_v4  ;;  %v112_v9 = vld [vmem:[%s2621_s1 + $0x60] sm:$0xff]  ;;  %v113_v10 = vld [vmem:[%s2621_s1 + $0x68] sm:$0xff] }
  0x27   :  { %174 = vxpose.xlu0.b32.cont [10/16] (narrow) %v77_v19, 8  ;;  %v44_v19 = vld [vmem:[%s2624_s4 + $0xb8] sm:$0xff]  ;;  %v1191_v47 = vld [vmem:[%s2620_s0 + $0x1f0] sm:$0xff]  ;;  %v152_v5 = vld [vmem:[%s2622_s2 + $0xa0] sm:$0xff] }
  0x28   :  { %v52_v13 = vld [vmem:[%s2624_s4 + $0xf8] sm:$0xff]  ;;  %v134_v3 = vld [vmem:[%s2622_s2 + $0x10] sm:$0xff] }
  0x29   :  { %v2135_v17 = vpack.c.bf16 %v52_v13, %v51_v11  ;;  %v1192_v49 = vld [vmem:[%s2620_s0 + $0x1f8] sm:$0xff]  ;;  %v136_v11 = vld [vmem:[%s2622_s2 + $0x20] sm:$0xff]  ;;  %v154_v13 = vld [vmem:[%s2622_s2 + $0xb0] sm:$0xff] }
  0x2a   :  { %207 = vxpose.xlu1.b32.cont [11/16] (narrow) %v94_v20, 8  ;;  %v27_v20 = vld [vmem:[%s2624_s4 + $0x30] sm:$0xff]  ;;  %v135_v4 = vld [vmem:[%s2622_s2 + $0x18] sm:$0xff] }
  0x2b   :  { %175 = vxpose.xlu0.b32.cont [11/16] (narrow) %v78_v21, 8  ;;  %v2002_v21 = vpack.c.bf16 %v44_v19, %v43_v18  ;;  %v130_v19 = vld [vmem:[%s2621_s1 + $0xf0] sm:$0xff] }
  0x2d   :  { %1486 = vmatprep.subr.bf16.mxu0 %v2002_v21 }
  0x2e   :  { %208 = vxpose.xlu1.b32.cont [12/16] (narrow) %v95_v22, 8  ;;  %v28_v22 = vld [vmem:[%s2624_s4 + $0x38] sm:$0xff] }
  0x2f   :  { %176 = vxpose.xlu0.b32.cont [12/16] (narrow) %v79_v23, 8  ;;  %v122_v23 = vld [vmem:[%s2621_s1 + $0xb0] sm:$0xff] }
  0x32   :  { %209 = vxpose.xlu1.b32.cont [13/16] (narrow) %v96_v24, 8  ;;  %v123_v24 = vld [vmem:[%s2621_s1 + $0xb8] sm:$0xff] }
  0x33   :  { %177 = vxpose.xlu0.b32.cont [13/16] (narrow) %v80_v25, 8  ;;  %v1515_v25 = vpack.c.bf16 %v105_v15, %v104_v14  ;;  %v35_v14 = vld [vmem:[%s2624_s4 + $0x70] sm:$0xff]  ;;  %v36_v15 = vld [vmem:[%s2624_s4 + $0x78] sm:$0xff] }
  0x34   :  { %v2137_v18 = vpack.c.bf16 %v36_v15, %v35_v14  ;;  %v155_v14 = vld [vmem:[%s2622_s2 + $0xb8] sm:$0xff] }
  0x35   :  { %1516 = vmatpush3.bf16.msra.mxu1 %v1515_v25 }
  0x36   :  { %210 = vxpose.xlu1.b32.cont [14/16] (narrow) %v97_v26, 8  ;;  %v1517_v26 = vpack.c.bf16 %v123_v24, %v122_v23  ;;  %v115_v24 = vld [vmem:[%s2621_s1 + $0x78] sm:$0xff] }
  0x37   :  { %178 = vxpose.xlu0.b32.cont [14/16] (narrow) %v81_v27, 8  ;;  %v106_v27 = vld [vmem:[%s2621_s1 + $0x30] sm:$0xff] }
  0x38   :  { %1518 = vmatprep.subr.bf16.mxu1 %v1517_v26  ;;  %v148_v26 = vld [vmem:[%s2622_s2 + $0x80] sm:$0xff] }
  0x3a   :  { %211 = vxpose.xlu1.b32.cont [15/16] (narrow) %v98_v28, 8  ;;  %v107_v28 = vld [vmem:[%s2621_s1 + $0x38] sm:$0xff] }
  0x3b   :  { %179 = vxpose.xlu0.b32.cont [15/16] (narrow) %v82_v29, 8  ;;  %v2020_v29 = vpack.c.bf16 %v28_v22, %v27_v20  ;;  %v131_v20 = vld [vmem:[%s2621_s1 + $0xf8] sm:$0xff]  ;;  %v114_v22 = vld [vmem:[%s2621_s1 + $0x70] sm:$0xff] }
  0x3c   :  { %v1533_v23 = vpack.c.bf16 %v131_v20, %v130_v19  ;;  %v1535_v25 = vpack.c.bf16 %v115_v24, %v114_v22  ;;  %v1549_v19 = vpack.c.bf16 %v155_v14, %v154_v13  ;;  %v138_v20 = vld [vmem:[%s2622_s2 + $0x30] sm:$0xff]  ;;  %v156_v22 = vld [vmem:[%s2622_s2 + $0xc0] sm:$0xff]  ;;  %v1220_v13 = vld [vmem:[%s2621_s1 + $0x1d8] sm:$0xff] }
  0x3d   :  { %1488 = vmatpush3.bf16.msra.mxu0 %v2020_v29 }
  0x3e   :  { %212 = vxpose.xlu1.b32.end [16/16] (narrow) %v99_v30, 8  ;;  %v1176_v30 = vld [vmem:[%s2620_s0 + $0x178] sm:$0xff] }
  0x3f   :  { %180 = vxpose.xlu0.b32.end [16/16] (narrow) %v83_v31, 8  ;;  %v1519_v31 = vpack.c.bf16 %v107_v28, %v106_v27  ;;  %v149_v27 = vld [vmem:[%s2622_s2 + $0x88] sm:$0xff] }
  0x40   :  { %v1537_v28 = vpack.c.bf16 %v149_v27, %v148_v26  ;;  %v158_v26 = vld [vmem:[%s2622_s2 + $0xd0] sm:$0xff] }
  0x41   :  { %1520 = vmatpush3.bf16.msra.mxu1 %v1519_v31  ;;  %v1178_v31 = vld [vmem:[%s2620_s0 + $0x188] sm:$0xff] }
  0x42   :  { %703 = vxpose.xlu1.b32.start [1/16] (narrow) %v1161_v32, 8 }
  0x46   :  { %704 = vxpose.xlu1.b32.cont [2/16] (narrow) %v1162_v33, 8 }
  0x4a   :  { %705 = vxpose.xlu1.b32.cont [3/16] (narrow) %v1163_v34, 8 }
  0x4e   :  { %706 = vxpose.xlu1.b32.cont [4/16] (narrow) %v1164_v35, 8  ;;  %v45_v35 = vld [vmem:[%s2624_s4 + $0xc0] sm:$0xff] }
  0x52   :  { %707 = vxpose.xlu1.b32.cont [5/16] (narrow) %v1165_v36, 8  ;;  %v46_v36 = vld [vmem:[%s2624_s4 + $0xc8] sm:$0xff] }
  0x56   :  { %708 = vxpose.xlu1.b32.cont [6/16] (narrow) %v1166_v37, 8  ;;  %v2039_v37 = vpack.c.bf16 %v46_v36, %v45_v35  ;;  %v1180_v35 = vld [vmem:[%s2620_s0 + $0x198] sm:$0xff]  ;;  %v1182_v36 = vld [vmem:[%s2620_s0 + $0x1a8] sm:$0xff] }
  0x58   :  { %1490 = vmatprep.subr.bf16.mxu0 %v2039_v37 }
  0x5a   :  { %709 = vxpose.xlu1.b32.cont [7/16] (narrow) %v1167_v38, 8  ;;  %v29_v38 = vld [vmem:[%s2624_s4 + $0x40] sm:$0xff] }
  0x5e   :  { %710 = vxpose.xlu1.b32.cont [8/16] (narrow) %v1168_v39, 8  ;;  %v30_v39 = vld [vmem:[%s2624_s4 + $0x48] sm:$0xff] }
  0x62   :  { %711 = vxpose.xlu1.b32.cont [9/16] (narrow) %v1169_v40, 8  ;;  %v124_v40 = vld [vmem:[%s2621_s1 + $0xc0] sm:$0xff] }
  0x66   :  { %712 = vxpose.xlu1.b32.cont [10/16] (narrow) %v1170_v41, 8  ;;  %v2050_v41 = vpack.c.bf16 %v30_v39, %v29_v38  ;;  %v1183_v38 = vld [vmem:[%s2620_s0 + $0x1b0] sm:$0xff]  ;;  %v1184_v39 = vld [vmem:[%s2620_s0 + $0x1b8] sm:$0xff] }
  0x68   :  { %1492 = vmatpush3.bf16.msra.mxu0 %v2050_v41 }
  0x69   :  { %1494 = vmatprep.subr.bf16.mxu0 %v2069_v50 }
  0x6a   :  { %713 = vxpose.xlu1.b32.cont [11/16] (narrow) %v1171_v42, 8  ;;  %v125_v42 = vld [vmem:[%s2621_s1 + $0xc8] sm:$0xff] }
  0x6b   :  { %v1521_v45 = vpack.c.bf16 %v125_v42, %v124_v40  ;;  %v1185_v40 = vld [vmem:[%s2620_s0 + $0x1c0] sm:$0xff]  ;;  %v1186_v42 = vld [vmem:[%s2620_s0 + $0x1c8] sm:$0xff] }
  0x6c   :  { %1496 = vmatpush3.bf16.msra.mxu0 %v2080_v55 }
  0x6d   :  { %1522 = vmatprep.subr.bf16.mxu1 %v1521_v45  ;;  %1498 = vmatprep.subr.bf16.mxu0 %v2102_v2  ;;  %v1189_v45 = vld [vmem:[%s2620_s0 + $0x1e0] sm:$0xff] }
  0x6e   :  { %714 = vxpose.xlu1.b32.cont [12/16] (narrow) %v1172_v43, 8  ;;  %v108_v43 = vld [vmem:[%s2621_s1 + $0x40] sm:$0xff] }
  0x70   :  { %1500 = vmatpush3.bf16.msra.mxu0 %v2113_v6 }
  0x71   :  { %1502 = vmatprep.subr.bf16.mxu0 %v2135_v17 }
  0x72   :  { %715 = vxpose.xlu1.b32.cont [13/16] (narrow) %v1173_v44, 8  ;;  %v109_v44 = vld [vmem:[%s2621_s1 + $0x48] sm:$0xff] }
  0x73   :  { %v1523_v46 = vpack.c.bf16 %v109_v44, %v108_v43  ;;  %v1187_v43 = vld [vmem:[%s2620_s0 + $0x1d0] sm:$0xff]  ;;  %v1188_v44 = vld [vmem:[%s2620_s0 + $0x1d8] sm:$0xff] }
  0x74   :  { %1504 = vmatpush3.bf16.msra.mxu0 %v2137_v18 }
  0x75   :  { %1524 = vmatpush3.bf16.msra.mxu1 %v1523_v46  ;;  %1538 = vmatprep.subr.bf16.mxu0 %v1537_v28  ;;  %v1190_v46 = vld [vmem:[%s2620_s0 + $0x1e8] sm:$0xff] }
  0x76   :  { %716 = vxpose.xlu1.b32.cont [14/16] (narrow) %v1174_v57, 8  ;;  %v110_v57 = vld [vmem:[%s2621_s1 + $0x50] sm:$0xff]  ;;  %1526 = vmatprep.subr.bf16.mxu1 %v1525_v59  ;;  %v133_v59 = vld [vmem:[%s2622_s2 + $0x8] sm:$0xff] }
  0x77   :  { %v1527_v60 = vpack.c.bf16 %v111_v58, %v110_v57  ;;  %v132_v58 = vld [vmem:[%s2622_s2] sm:$0xff] }
  0x78   :  { %v1539_v61 = vpack.c.bf16 %v133_v59, %v132_v58 }
  0x79   :  { %1528 = vmatpush3.bf16.msra.mxu1 %v1527_v60  ;;  %v150_v60 = vld [vmem:[%s2622_s2 + $0x90] sm:$0xff] }
  0x7a   :  { %717 = vxpose.xlu1.b32.cont [15/16] (narrow) %v1175_v12, 8  ;;  %v1531_v12 = vpack.c.bf16 %v113_v10, %v112_v9  ;;  %1530 = vmatprep.subr.bf16.mxu1 %v1529_v7  ;;  %v153_v7 = vld [vmem:[%s2622_s2 + $0xa8] sm:$0xff]  ;;  %v1543_v9 = vpack.c.bf16 %v135_v4, %v134_v3  ;;  %v1200_v3 = vld [vmem:[%s2621_s1 + $0x138] sm:$0xff]  ;;  %v1217_v4 = vld [vmem:[%s2621_s1 + $0x1c0] sm:$0xff] }
  0x7b   :  { %v1545_v10 = vpack.c.bf16 %v153_v7, %v152_v5  ;;  %v1218_v5 = vld [vmem:[%s2621_s1 + $0x1c8] sm:$0xff] }
  0x7d   :  { %1532 = vmatpush3.bf16.msra.mxu1 %v1531_v12  ;;  %v137_v12 = vld [vmem:[%s2622_s2 + $0x28] sm:$0xff] }
  0x7e   :  { %718 = vxpose.xlu1.b32.end [16/16] (narrow) %v1176_v30, 8  ;;  %1534 = vmatprep.subr.bf16.mxu1 %v1533_v23  ;;  %v1177_v30 = vld [vmem:[%s2620_s0 + $0x180] sm:$0xff]  ;;  %v1547_v15 = vpack.c.bf16 %v137_v12, %v136_v11  ;;  %v1202_v11 = vld [vmem:[%s2621_s1 + $0x148] sm:$0xff]  ;;  %v1219_v12 = vld [vmem:[%s2621_s1 + $0x1d0] sm:$0xff] }
  0x81   :  { %1536 = vmatpush3.bf16.msra.mxu1 %v1535_v25  ;;  %v140_v25 = vld [vmem:[%s2622_s2 + $0x40] sm:$0xff] }
  0x82   :  { %v2027_v32 = vpop.trf.xlu1  ;;  %1570 = vmatprep.subr.bf16.mxu1 %v1907_v48  ;;  %v1181_v48 = vld [vmem:[%s2620_s0 + $0x1a0] sm:$0xff] }
  0x83   :  { %v2029_v33 = vpop.trf.xlu0 }
  0x84   :  { %v229_v34 = vmax.f32 %v2029_v33, %v2027_v32 }
  0x86   :  { %230 = vmax.xlane.f32.xlu0 %v229_v34  ;;  %v1179_v34 = vld [vmem:[%s2620_s0 + $0x190] sm:$0xff] }
  0xb3   :  { %735 = vxpose.xlu0.b32.start [1/16] (narrow) %v1177_v30, 8 }
  0xb7   :  { %736 = vxpose.xlu0.b32.cont [2/16] (narrow) %v1178_v31, 8 }
  0xbb   :  { %737 = vxpose.xlu0.b32.cont [3/16] (narrow) %v1179_v34, 8  ;;  %v143_v34 = vld [vmem:[%s2622_s2 + $0x58] sm:$0xff] }
  0xbf   :  { %738 = vxpose.xlu0.b32.cont [4/16] (narrow) %v1180_v35, 8  ;;  %v160_v35 = vld [vmem:[%s2622_s2 + $0xe0] sm:$0xff] }
  0xc2   :  { %v2280_v27 = vpop.trf.xlu1 }
  0xc3   :  { %739 = vxpose.xlu0.b32.cont [5/16] (narrow) %v1181_v48, 8  ;;  %v161_v48 = vld [vmem:[%s2622_s2 + $0xe8] sm:$0xff] }
  0xc7   :  { %740 = vxpose.xlu0.b32.cont [6/16] (narrow) %v1182_v36, 8 }
  0xcb   :  { %741 = vxpose.xlu0.b32.cont [7/16] (narrow) %v1183_v38, 8  ;;  %v1561_v38 = vpack.c.bf16 %v161_v48, %v160_v35  ;;  %v1208_v35 = vld [vmem:[%s2621_s1 + $0x178] sm:$0xff] }
  0xcf   :  { %742 = vxpose.xlu0.b32.cont [8/16] (narrow) %v1184_v39, 8  ;;  %v145_v39 = vld [vmem:[%s2622_s2 + $0x68] sm:$0xff] }
  0xd3   :  { %743 = vxpose.xlu0.b32.cont [9/16] (narrow) %v1185_v40, 8  ;;  %v162_v40 = vld [vmem:[%s2622_s2 + $0xf0] sm:$0xff] }
  0xd7   :  { %744 = vxpose.xlu0.b32.cont [10/16] (narrow) %v1186_v42, 8 }
  0xdb   :  { %745 = vxpose.xlu0.b32.cont [11/16] (narrow) %v1187_v43, 8 }
  0xdf   :  { %746 = vxpose.xlu0.b32.cont [12/16] (narrow) %v1188_v44, 8  ;;  %v146_v44 = vld [vmem:[%s2622_s2 + $0x70] sm:$0xff] }
  0xe3   :  { %747 = vxpose.xlu0.b32.cont [13/16] (narrow) %v1189_v45, 8  ;;  %v1209_v45 = vld [vmem:[%s2621_s1 + $0x180] sm:$0xff] }
  0xe7   :  { %748 = vxpose.xlu0.b32.cont [14/16] (narrow) %v1190_v46, 8 }
  0xeb   :  { %749 = vxpose.xlu0.b32.cont [15/16] (narrow) %v1191_v47, 8 }
  0xef   :  { %750 = vxpose.xlu0.b32.end [16/16] (narrow) %v1192_v49, 8  ;;  %v1193_v49 = vld [vmem:[%s2621_s1 + $0x100] sm:$0xff] }
 0x113   :  { %v231_v51 = vpop.xlane.xlu0 %230 }
 0x114   :  { %v232_v53 = vsub.f32 %v2029_v33, %v231_v51  ;;  %v233_v54 = vsub.f32 %v2027_v32, %v231_v51  ;;  %v151_v32 = vld [vmem:[%s2622_s2 + $0x98] sm:$0xff]  ;;  %v1211_v51 = vld [vmem:[%s2621_s1 + $0x190] sm:$0xff] }
 0x115   :  { %v1541_v1 = vpack.c.bf16 %v151_v32, %v150_v60  ;;  %v1197_v60 = vld [vmem:[%s2621_s1 + $0x120] sm:$0xff]  ;;  %v1215_v32 = vld [vmem:[%s2621_s1 + $0x1b0] sm:$0xff] }
 0x116   :  { %v234_v56 = vmul.f32 1.442695, %v232_v53  ;;  %v236_v57 = vmul.f32 1.442695, %v233_v54 }
 0x118   :  { %1691 = vpow2.f32 %v234_v56  ;;  %v1195_v56 = vld [vmem:[%s2621_s1 + $0x110] sm:$0xff] }
 0x119   :  { %1693 = vpow2.f32 %v236_v57  ;;  %v1213_v57 = vld [vmem:[%s2621_s1 + $0x1a0] sm:$0xff] }
 0x122   :  { %v2222_v33 = vpop.eup %1691 }
 0x123   :  { %v1694_v0 = vpop.eup %1693 }
 0x124   :  { %302 = vmatprep.mubr.f32.mxu0 %v1694_v0  ;;  %426 = vmatprep.mubr.f32.mxu1 %v1694_v0 }
 0x125   :  { %303 = vmatmul.mubr.f32.vlgmr.msra.gmra.mrb[0].mxu0 %v2222_v33  ;;  %427 = vmatmul.mubr.f32.vlgmr.msra.gmra.mrb[0].mxu1 %v2222_v33 }
 0x126   :  { %1540 = vmatpush3.bf16.msra.mxu0 %v1539_v61  ;;  %560 = vmatprep.mubr.f32.mxu0 %v1694_v0 }
 0x127   :  { %1542 = vmatprep.subr.bf16.mxu0 %v1541_v1  ;;  %1572 = vmatpush3.bf16.msra.mxu1 %v1918_v52  ;;  %v139_v52 = vld [vmem:[%s2622_s2 + $0x38] sm:$0xff]  ;;  %v1199_v1 = vld [vmem:[%s2621_s1 + $0x130] sm:$0xff] }
 0x128   :  { %1574 = vmatprep.subr.bf16.mxu1 %v1943_v62  ;;  %v157_v62 = vld [vmem:[%s2622_s2 + $0xc8] sm:$0xff]  ;;  %v1551_v23 = vpack.c.bf16 %v139_v52, %v138_v20  ;;  %v1615_v7 = vpack.c.bf16 %v1200_v3, %v1199_v1  ;;  %v1621_v20 = vpack.c.bf16 %v1220_v13, %v1219_v12  ;;  %v1203_v52 = vld [vmem:[%s2621_s1 + $0x150] sm:$0xff]  ;;  %v1252_v1 = vld [vmem:[%s2622_s2 + $0x1d8] sm:$0xff]  ;;  %v53_v12 = vlaneseq }
 0x129   :  { %v1553_v24 = vpack.c.bf16 %v157_v62, %v156_v22  ;;  %v1204_v22 = vld [vmem:[%s2621_s1 + $0x158] sm:$0xff] }
 0x12a   :  { %1544 = vmatpush3.bf16.msra.mxu0 %v1543_v9  ;;  %v1617_v9 = vpack.c.bf16 %v1218_v5, %v1217_v4  ;;  %v1235_v5 = vld [vmem:[%s2622_s2 + $0x150] sm:$0xff] }
 0x12b   :  { %1546 = vmatprep.subr.bf16.mxu0 %v1545_v10  ;;  %1576 = vmatpush3.bf16.msra.mxu1 %v1945_v63  ;;  %v141_v63 = vld [vmem:[%s2622_s2 + $0x48] sm:$0xff]  ;;  %v1201_v10 = vld [vmem:[%s2621_s1 + $0x140] sm:$0xff] }
 0x12c   :  { %1578 = vmatprep.subr.bf16.mxu1 %v1966_v8  ;;  %v159_v8 = vld [vmem:[%s2622_s2 + $0xd8] sm:$0xff]  ;;  %v1555_v28 = vpack.c.bf16 %v141_v63, %v140_v25  ;;  %v1619_v14 = vpack.c.bf16 %v1202_v11, %v1201_v10  ;;  %v1623_v25 = vpack.c.bf16 %v1204_v22, %v1203_v52  ;;  %v1254_v10 = vld [vmem:[%s2622_s2 + $0x1e8] sm:$0xff]  ;;  %v56_v22 = vshrl.u32 %v53_v12, 7 }
 0x12d   :  { %v1557_v31 = vpack.c.bf16 %v159_v8, %v158_v26  ;;  %v1205_v26 = vld [vmem:[%s2621_s1 + $0x160] sm:$0xff]  ;;  %v1206_v8 = vld [vmem:[%s2621_s1 + $0x168] sm:$0xff] }
 0x12e   :  { %1548 = vmatpush3.bf16.msra.mxu0 %v1547_v15  ;;  %v1241_v15 = vld [vmem:[%s2622_s2 + $0x180] sm:$0xff] }
 0x12f   :  { %1550 = vmatprep.subr.bf16.mxu0 %v1549_v19  ;;  %1580 = vmatpush3.bf16.msra.mxu1 %v1990_v16  ;;  %v142_v16 = vld [vmem:[%s2622_s2 + $0x50] sm:$0xff]  ;;  %v1242_v19 = vld [vmem:[%s2622_s2 + $0x188] sm:$0xff] }
 0x130   :  { %1582 = vmatprep.subr.bf16.mxu1 %v2002_v21  ;;  %v1559_v36 = vpack.c.bf16 %v143_v34, %v142_v16  ;;  %v1633_v62 = vpack.c.bf16 %v1242_v19, %v1241_v15  ;;  %v1627_v16 = vpack.c.bf16 %v1206_v8, %v1205_v26  ;;  %v1238_v15 = vld [vmem:[%s2622_s2 + $0x168] sm:$0xff]  ;;  %v1255_v19 = vld [vmem:[%s2622_s2 + $0x1f0] sm:$0xff]  ;;  %v2524_v26 = vand.u32 127, %v53_v12 }
 0x132   :  { %1552 = vmatpush3.bf16.msra.mxu0 %v1551_v23  ;;  %v1221_v23 = vld [vmem:[%s2621_s1 + $0x1e0] sm:$0xff]  ;;  %vm65_vm3 = vcmp.eq.s32.totalorder %v56_v22, %v2524_v26 }
 0x133   :  { %v2282_v30 = vpop.trf.xlu0  ;;  %1554 = vmatprep.subr.bf16.mxu0 %v1553_v24  ;;  %1584 = vmatpush3.bf16.msra.mxu1 %v2020_v29  ;;  %v144_v29 = vld [vmem:[%s2622_s2 + $0x60] sm:$0xff]  ;;  %v1222_v24 = vld [vmem:[%s2621_s1 + $0x1e8] sm:$0xff] }
 0x134   :  { %v767_v21 = vmax.f32 %v2280_v27, %v2282_v30  ;;  %1586 = vmatprep.subr.bf16.mxu1 %v2039_v37  ;;  %v163_v37 = vld [vmem:[%s2622_s2 + $0xf8] sm:$0xff]  ;;  %v1563_v42 = vpack.c.bf16 %v145_v39, %v144_v29  ;;  %v1625_v63 = vpack.c.bf16 %v1222_v24, %v1221_v23  ;;  %v1239_v23 = vld [vmem:[%s2622_s2 + $0x170] sm:$0xff] }
 0x135   :  { %v1565_v43 = vpack.c.bf16 %v163_v37, %v162_v40  ;;  %v1225_v37 = vld [vmem:[%s2622_s2 + $0x100] sm:$0xff]  ;;  %v1240_v24 = vld [vmem:[%s2622_s2 + $0x178] sm:$0xff] }
 0x136   :  { %1556 = vmatpush3.bf16.msra.mxu0 %v1555_v28  ;;  %768 = vmax.xlane.f32.xlu1 %v767_v21  ;;  %v1223_v28 = vld [vmem:[%s2621_s1 + $0x1f0] sm:$0xff] }
 0x137   :  { %1558 = vmatprep.subr.bf16.mxu0 %v1557_v31  ;;  %1588 = vmatpush3.bf16.msra.mxu1 %v2050_v41  ;;  %v147_v41 = vld [vmem:[%s2622_s2 + $0x78] sm:$0xff]  ;;  %v1207_v21 = vld [vmem:[%s2621_s1 + $0x170] sm:$0xff] }
 0x138   :  { %1590 = vmatprep.subr.bf16.mxu1 %v2069_v50  ;;  %v1210_v50 = vld [vmem:[%s2621_s1 + $0x188] sm:$0xff]  ;;  %v1567_v46 = vpack.c.bf16 %v147_v41, %v146_v44  ;;  %v1224_v31 = vld [vmem:[%s2621_s1 + $0x1f8] sm:$0xff]  ;;  %v1631_v48 = vpack.c.bf16 %v1208_v35, %v1207_v21  ;;  %v1727_v21 = vmov 0.0  }
 0x139   :  { %v1601_v47 = vpack.c.bf16 %v1210_v50, %v1209_v45  ;;  %v1629_v34 = vpack.c.bf16 %v1224_v31, %v1223_v28  ;;  %v1227_v50 = vld [vmem:[%s2622_s2 + $0x110] sm:$0xff] }
 0x13a   :  { %1560 = vmatpush3.bf16.msra.mxu0 %v1559_v36 }
 0x13b   :  { %1562 = vmatprep.subr.bf16.mxu0 %v1561_v38  ;;  %1592 = vmatpush3.bf16.msra.mxu1 %v2080_v55  ;;  %v1194_v55 = vld [vmem:[%s2621_s1 + $0x108] sm:$0xff] }
 0x13c   :  { %1594 = vmatprep.subr.bf16.mxu1 %v2102_v2  ;;  %v1212_v2 = vld [vmem:[%s2621_s1 + $0x198] sm:$0xff]  ;;  %v1603_v53 = vpack.c.bf16 %v1194_v55, %v1193_v49  ;;  %v1246_v49 = vld [vmem:[%s2622_s2 + $0x1a8] sm:$0xff] }
 0x13d   :  { %v1605_v54 = vpack.c.bf16 %v1212_v2, %v1211_v51  ;;  %v1229_v2 = vld [vmem:[%s2622_s2 + $0x120] sm:$0xff] }
 0x13e   :  { %1564 = vmatpush3.bf16.msra.mxu0 %v1563_v42  ;;  %v1226_v42 = vld [vmem:[%s2622_s2 + $0x108] sm:$0xff] }
 0x13f   :  { %1566 = vmatprep.subr.bf16.mxu0 %v1565_v43  ;;  %1596 = vmatpush3.bf16.msra.mxu1 %v2113_v6  ;;  %v1196_v6 = vld [vmem:[%s2621_s1 + $0x118] sm:$0xff]  ;;  %v1243_v43 = vld [vmem:[%s2622_s2 + $0x190] sm:$0xff]  ;;  %v1635_v44 = vpack.c.bf16 %v1226_v42, %v1225_v37 }
 0x140   :  { %1598 = vmatprep.subr.bf16.mxu1 %v2135_v17  ;;  %v1214_v17 = vld [vmem:[%s2621_s1 + $0x1a8] sm:$0xff]  ;;  %v1607_v58 = vpack.c.bf16 %v1196_v6, %v1195_v56  ;;  %v1248_v56 = vld [vmem:[%s2622_s2 + $0x1b8] sm:$0xff] }
 0x141   :  { %v1609_v59 = vpack.c.bf16 %v1214_v17, %v1213_v57  ;;  %v1231_v17 = vld [vmem:[%s2622_s2 + $0x130] sm:$0xff] }
 0x142   :  { %1568 = vmatpush3.bf16.msra.mxu0 %v1567_v46  ;;  %v1228_v46 = vld [vmem:[%s2622_s2 + $0x118] sm:$0xff] }
 0x143   :  { %1602 = vmatprep.subr.bf16.mxu0 %v1601_v47  ;;  %1600 = vmatpush3.bf16.msra.mxu1 %v2137_v18  ;;  %v1198_v18 = vld [vmem:[%s2621_s1 + $0x128] sm:$0xff]  ;;  %v1245_v47 = vld [vmem:[%s2622_s2 + $0x1a0] sm:$0xff]  ;;  %v1639_v55 = vpack.c.bf16 %v1228_v46, %v1227_v50 }
 0x144   :  { %v1611_v61 = vpack.c.bf16 %v1198_v18, %v1197_v60  ;;  %1634 = vmatprep.subr.bf16.mxu1 %v1633_v62  ;;  %v1641_v51 = vpack.c.bf16 %v1246_v49, %v1245_v47  ;;  %v1250_v60 = vld [vmem:[%s2622_s2 + $0x1c8] sm:$0xff] }
 0x145   :  { %561 = vmatmul.mubr.f32.vlgmr.msra.gmra.mrb[2].mxu0 %v2222_v33  ;;  %v1216_v33 = vld [vmem:[%s2621_s1 + $0x1b8] sm:$0xff]  ;;  %s1729_s1 = smov 127  }
 0x146   :  { %1604 = vmatpush3.bf16.msra.mxu0 %v1603_v53  ;;  %v1613_v0 = vpack.c.bf16 %v1216_v33, %v1215_v32  ;;  %v1230_v53 = vld [vmem:[%s2622_s2 + $0x128] sm:$0xff]  ;;  %v1233_v33 = vld [vmem:[%s2622_s2 + $0x140] sm:$0xff] }
 0x147   :  { %1606 = vmatprep.subr.bf16.mxu0 %v1605_v54  ;;  %v1247_v54 = vld [vmem:[%s2622_s2 + $0x1b0] sm:$0xff]  ;;  %v1643_v6 = vpack.c.bf16 %v1230_v53, %v1229_v2  ;;  %v2552_v2 = vld [vmem:[%s2623_s3] sm:$0xff] }
 0x148   :  { %v1645_v57 = vpack.c.bf16 %v1248_v56, %v1247_v54 }
 0x14a   :  { %1608 = vmatpush3.bf16.msra.mxu0 %v1607_v58  ;;  %v1232_v58 = vld [vmem:[%s2622_s2 + $0x138] sm:$0xff] }
 0x14b   :  { %1610 = vmatprep.subr.bf16.mxu0 %v1609_v59  ;;  %v1249_v59 = vld [vmem:[%s2622_s2 + $0x1c0] sm:$0xff]  ;;  %v1647_v18 = vpack.c.bf16 %v1232_v58, %v1231_v17 }
 0x14c   :  { %v1649_v32 = vpack.c.bf16 %v1250_v60, %v1249_v59 }
 0x14e   :  { %1612 = vmatpush3.bf16.msra.mxu0 %v1611_v61  ;;  %v1234_v61 = vld [vmem:[%s2622_s2 + $0x148] sm:$0xff] }
 0x14f   :  { %1614 = vmatprep.subr.bf16.mxu0 %v1613_v0  ;;  %v1251_v0 = vld [vmem:[%s2622_s2 + $0x1d0] sm:$0xff]  ;;  %v1651_v3 = vpack.c.bf16 %v1234_v61, %v1233_v33 }
 0x150   :  { %v1653_v4 = vpack.c.bf16 %v1252_v1, %v1251_v0 }
 0x152   :  { %1616 = vmatpush3.bf16.msra.mxu0 %v1615_v7  ;;  %v1236_v7 = vld [vmem:[%s2622_s2 + $0x158] sm:$0xff] }
 0x153   :  { %1618 = vmatprep.subr.bf16.mxu0 %v1617_v9  ;;  %v1253_v9 = vld [vmem:[%s2622_s2 + $0x1e0] sm:$0xff]  ;;  %v1655_v11 = vpack.c.bf16 %v1236_v7, %v1235_v5 }
 0x154   :  { %v1657_v13 = vpack.c.bf16 %v1254_v10, %v1253_v9 }
 0x156   :  { %1620 = vmatpush3.bf16.msra.mxu0 %v1619_v14  ;;  %v1237_v14 = vld [vmem:[%s2622_s2 + $0x160] sm:$0xff] }
 0x157   :  { %1622 = vmatprep.subr.bf16.mxu0 %v1621_v20  ;;  %v1256_v20 = vld [vmem:[%s2622_s2 + $0x1f8] sm:$0xff]  ;;  %v1659_v52 = vpack.c.bf16 %v1238_v15, %v1237_v14 }
 0x158   :  { %v1661_v62 = vpack.c.bf16 %v1256_v20, %v1255_v19 }
 0x15a   :  { %1624 = vmatpush3.bf16.msra.mxu0 %v1623_v25  ;;  %v1663_v25 = vpack.c.bf16 %v1240_v24, %v1239_v23 }
 0x15b   :  { %1626 = vmatprep.subr.bf16.mxu0 %v1625_v63  ;;  %v57_v63 = vmul.u32 2, %v56_v22 }
 0x15d   :  { %v61_v8 = vadd.s32 1, %v57_v63  ;;  %vm58_vm1 = vcmp.eq.s32.totalorder %v2524_v26, %v57_v63 }
 0x15e   :  { %1628 = vmatpush3.bf16.msra.mxu0 %v1627_v16 }
 0x15f   :  { %1630 = vmatprep.subr.bf16.mxu0 %v1629_v34  ;;  %vm62_vm0 = vcmp.eq.s32.totalorder %v2524_v26, %v61_v8 }
 0x160   :  { %v1154_v35 = vsel %vm62_vm0, 1.0, %v1727_v21  ;;  %vm597_vm0 = vcmp.eq.s32.totalorder %v2524_v26, 0 }
 0x162   :  { %1632 = vmatpush3.bf16.msra.mxu0 %v1631_v48 }
 0x1c3   :  { %v769_v36 = vpop.xlane.xlu1 %768 }
 0x1c4   :  { %v770_v38 = vsub.f32 %v2280_v27, %v769_v36  ;;  %v771_v29 = vsub.f32 %v2282_v30, %v769_v36  ;;  %v1244_v27 = vld [vmem:[%s2622_s2 + $0x198] sm:$0xff]  ;;  %s1728_s2 = smov 126  }
 0x1c5   :  { %v1637_v45 = vpack.c.bf16 %v1244_v27, %v1243_v43 }
 0x1c6   :  { %v772_v39 = vmul.f32 1.442695, %v770_v38  ;;  %v774_v40 = vmul.f32 1.442695, %v771_v29  ;;  %v1153_v38 = vsel %vm58_vm1, 1.0, %v1727_v21 }
 0x1c8   :  { %1695 = vpow2.f32 %v772_v39 }
 0x1c9   :  { %1697 = vpow2.f32 %v774_v40 }
 0x1d2   :  { %v2442_v30 = vpop.eup %1695 }
 0x1d3   :  { %v1698_v41 = vpop.eup %1697 }
 0x1d4   :  { %840 = vmatprep.mubr.f32.mxu1 %v1698_v41  ;;  %963 = vmatprep.mubr.f32.mxu0 %v1698_v41 }
 0x1d5   :  { %841 = vmatmul.mubr.f32.vlgmr.msra.gmra.mrb[2].mxu1 %v2442_v30  ;;  %964 = vmatmul.mubr.f32.vlgmr.msra.gmra.mrb[4].mxu0 %v2442_v30 }
 0x1d6   :  { %1636 = vmatpush3.bf16.msra.mxu1 %v1635_v44  ;;  %1096 = vmatprep.mubr.f32.mxu1 %v1698_v41  ;;  %v1155_v44 = vsel %vm65_vm3, 1.0, %v1727_v21 }
 0x1d7   :  { %1638 = vmatprep.subr.bf16.mxu1 %v1637_v45 }
 0x1da   :  { %1640 = vmatpush3.bf16.msra.mxu1 %v1639_v55 }
 0x1db   :  { %1642 = vmatprep.subr.bf16.mxu1 %v1641_v51 }
 0x1de   :  { %1644 = vmatpush3.bf16.msra.mxu1 %v1643_v6 }
 0x1df   :  { %1646 = vmatprep.subr.bf16.mxu1 %v1645_v57 }
 0x1e2   :  { %1648 = vmatpush3.bf16.msra.mxu1 %v1647_v18 }
 0x1e3   :  { %1650 = vmatprep.subr.bf16.mxu1 %v1649_v32 }
 0x1e6   :  { %1652 = vmatpush3.bf16.msra.mxu1 %v1651_v3 }
 0x1e7   :  { %1654 = vmatprep.subr.bf16.mxu1 %v1653_v4 }
 0x1ea   :  { %1656 = vmatpush3.bf16.msra.mxu1 %v1655_v11 }
 0x1eb   :  { %1658 = vmatprep.subr.bf16.mxu1 %v1657_v13 }
 0x1ee   :  { %1660 = vmatpush3.bf16.msra.mxu1 %v1659_v52  ;;  %v2570_v52 = vld [vmem:[%s2623_s3 + $0x8] sm:$0xff] }
 0x1ef   :  { %1662 = vmatprep.subr.bf16.mxu1 %v1661_v62 }
 0x1f2   :  { %1664 = vmatpush3.bf16.msra.mxu1 %v1663_v25 }
 0x1f5   :  { %1097 = vmatmul.mubr.f32.vlgmr.msra.gmra.mrb[4].mxu1 %v2442_v30 }
 0x1f8   :  { %v1295_v28 = vpop.f32.mrb[0].mxu0  ;;  %v1330_v31 = vpop.f32.mrb[0].mxu1 }
 0x1f9   :  { %v1296_v16 = vpop.f32.mrb[1].mxu0  ;;  %v1331_v34 = vpop.f32.mrb[1].mxu1 }
 0x1fa   :  { %v2529_v48 = vadd.f32 %v1296_v16, %v1295_v28  ;;  %v1332_v36 = vadd.f32 %v1331_v34, %v1330_v31 }
 0x1fc   :  { %v437_v29 = vmul.f32 %v1332_v36, %v1154_v35  ;;  %v432_v40 = vmul.f32 %v1332_v36, %v1153_v38  ;;  %1699 = vrcp.f32 %v2529_v48 }
 0x1fe   :  { %v438_v39 = vsel %vm433_vm2, %v437_v29, 0.0  ;;  %v434_v37 = vsel %vm433_vm2, %v432_v40, 0.0 }
 0x1ff   :  { %439 = vadd.xlane.f32.xlu1 %v438_v39 }
 0x203   :  { %435 = vadd.xlane.f32.xlu1 %v434_v37 }
 0x206   :  { %v2534_v42 = vpop.eup %1699 }
 0x214   :  { %311 = vrot.lane.b32.xlu1 %v2534_v42, %s1728_s2 }
 0x218   :  { %v1365_v43 = vpop.f32.mrb[2].mxu0  ;;  %315 = vrot.lane.b32.xlu1 %v2534_v42, %s1729_s1 }
 0x219   :  { %v1366_v27 = vpop.f32.mrb[3].mxu0 }
 0x21a   :  { %v1367_v30 = vadd.f32 %v1366_v27, %v1365_v43 }
 0x21c   :  { %v566_v41 = vmul.f32 %v1367_v30, %v1155_v44 }
 0x21e   :  { %v568_v45 = vsel %vm567_vm4, %v566_v41, 0.0 }
 0x23c   :  { %569 = vadd.xlane.f32.xlu1 %v568_v45 }
 0x28c   :  { %v440_v50 = vpop.xlane.xlu1 %439 }
 0x28d   :  { %v447_v46 = vmul.f32 %v2534_v42, %v440_v50 }
 0x28f   :  { %449 = vrot.lane.b32.xlu0 %v447_v46, %s1729_s1 }
 0x290   :  { %v2544_v47 = vpop.xlane.xlu1 %435 }
 0x294   :  { %v2546_v49 = vpop.permute.xlu1 %311 }
 0x295   :  { %v314_v45 = vmul.f32 %v2529_v48, %v2546_v49 }
 0x298   :  { %v316_v55 = vpop.permute.xlu1 %315 }
 0x299   :  { %v318_v51 = vmul.f32 %v2529_v48, %v316_v55 }
 0x29b   :  { %v337_v53 = vsub.f32 %v2552_v2, %v318_v51 }
 0x29d   :  { %v338_v54 = vand.u32 2147483647, %v337_v53  ;;  %v319_v53 = vsub.f32 %v2552_v2, %v314_v45 }
 0x29f   :  { %v340_v56 = vmul.f32 0.5, %v338_v54  ;;  %v1157_v57 = vadd.f32 -0.5, %v338_v54  ;;  %vm339_vm5 = vcmp.le.f32.partialorder %v338_v54, 1.0 }
 0x2a1   :  { %v341_v6 = vmul.f32 %v340_v56, %v338_v54 }
 0x2a3   :  { %v343_v17 = vsel %vm339_vm5, %v341_v6, %v1157_v57  ;;  %v320_v6 = vand.u32 2147483647, %v319_v53 }
 0x2a4   :  { %345 = vrot.lane.b32.xlu0 %v343_v17, %s1729_s1 }
 0x2a5   :  { %v322_v57 = vmul.f32 0.5, %v320_v6  ;;  %v1156_v48 = vadd.f32 -0.5, %v320_v6  ;;  %vm321_vm10 = vcmp.le.f32.partialorder %v320_v6, 1.0 }
 0x2a7   :  { %v323_v17 = vmul.f32 %v322_v57, %v320_v6 }
 0x2a8   :  { %v1400_v58 = vpop.f32.mrb[2].mxu1  ;;  %v1435_v59 = vpop.f32.mrb[4].mxu0 }
 0x2a9   :  { %v1401_v60 = vpop.f32.mrb[3].mxu1  ;;  %v1436_v18 = vpop.f32.mrb[5].mxu0  ;;  %v325_v49 = vsel %vm321_vm10, %v323_v17, %v1156_v48 }
 0x2aa   :  { %v2556_v32 = vadd.f32 %v1401_v60, %v1400_v58  ;;  %v1437_v33 = vadd.f32 %v1436_v18, %v1435_v59  ;;  %v327_v58 = vsel %vm326_vm11, %v325_v49, 0.0  ;;  %v441_v59 = vmul.f32 %v2534_v42, %v2544_v47 }
 0x2ac   :  { %1701 = vrcp.f32 %v2556_v32  ;;  %v973_v4 = vmul.f32 %v1437_v33, %v1154_v35  ;;  %v969_v7 = vmul.f32 %v1437_v33, %v1153_v38 }
 0x2ae   :  { %v974_v5 = vsel %vm433_vm2, %v973_v4, 0.0  ;;  %v970_v9 = vsel %vm433_vm2, %v969_v7, 0.0 }
 0x2b6   :  { %v1702_v61 = vpop.eup %1701 }
 0x2b7   :  { %853 = vrot.lane.b32.xlu1 %v1702_v61, %s1729_s1  ;;  %849 = vrot.lane.b32.xlu0 %v1702_v61, %s1728_s2 }
 0x2c8   :  { %v1470_v0 = vpop.f32.mrb[4].mxu1 }
 0x2c9   :  { %v1471_v1 = vpop.f32.mrb[5].mxu1  ;;  %v570_v12 = vpop.xlane.xlu1 %569 }
 0x2ca   :  { %v1472_v3 = vadd.f32 %v1471_v1, %v1470_v0  ;;  %v571_v13 = vmul.f32 %v2534_v42, %v570_v12 }
 0x2cc   :  { %v1102_v10 = vmul.f32 %v1472_v3, %v1155_v44  ;;  %v572_v15 = vsub.f32 %v2552_v2, %v571_v13 }
 0x2ce   :  { %v1103_v11 = vsel %vm567_vm4, %v1102_v10, 0.0  ;;  %v573_v22 = vand.u32 2147483647, %v572_v15 }
 0x2d0   :  { %v575_v28 = vmul.f32 0.16666667, %v573_v22  ;;  %v1160_v38 = vadd.f32 -1.5, %v573_v22  ;;  %vm574_vm6 = vcmp.le.f32.partialorder %v573_v22, 3.0 }
 0x2d2   :  { %v576_v21 = vmul.f32 %v575_v28, %v573_v22 }
 0x2d4   :  { %v578_v39 = vsel %vm574_vm6, %v576_v21, %v1160_v38 }
 0x2db   :  { %975 = vadd.xlane.f32.xlu1 %v974_v5 }
 0x2df   :  { %971 = vadd.xlane.f32.xlu1 %v970_v9 }
 0x2e3   :  { %1104 = vadd.xlane.f32.xlu1 %v1103_v11 }
 0x301   :  { %v450_v20 = vpop.permute.xlu0 %449 }
 0x302   :  { %v452_v62 = vadd.f32 %v450_v20, %v318_v51 }
 0x304   :  { %v470_v63 = vsub.f32 %v2552_v2, %v452_v62 }
 0x306   :  { %v471_v34 = vand.u32 2147483647, %v470_v63 }
 0x308   :  { %v473_v37 = vmul.f32 0.5, %v471_v34  ;;  %v1159_v46 = vadd.f32 -0.5, %v471_v34  ;;  %vm472_vm8 = vcmp.le.f32.partialorder %v471_v34, 1.0 }
 0x30a   :  { %v474_v41 = vmul.f32 %v473_v37, %v471_v34 }
 0x30c   :  { %v476_v55 = vsel %vm472_vm8, %v474_v41, %v1159_v46 }
 0x316   :  { %v346_v60 = vpop.permute.xlu0 %345 }
 0x317   :  { %v348_v18 = vsel %vm326_vm11, %v346_v60, 0.0 }
 0x329   :  { %v854_v14 = vpop.permute.xlu1 %853  ;;  %v850_v33 = vpop.permute.xlu0 %849 }
 0x32a   :  { %v856_v19 = vmul.f32 %v2556_v32, %v854_v14  ;;  %v852_v15 = vmul.f32 %v2556_v32, %v850_v33 }
 0x32c   :  { %v874_v23 = vsub.f32 %v2570_v52, %v856_v19  ;;  %v857_v20 = vsub.f32 %v2570_v52, %v852_v15 }
 0x32e   :  { %v875_v8 = vand.u32 2147483647, %v874_v23 }
 0x330   :  { %v877_v35 = vmul.f32 0.5, %v875_v8  ;;  %v1259_v27 = vadd.f32 -0.5, %v875_v8  ;;  %vm876_vm7 = vcmp.le.f32.partialorder %v875_v8, 1.0 }
 0x332   :  { %v878_v40 = vmul.f32 %v877_v35, %v875_v8 }
 0x334   :  { %v880_v44 = vsel %vm876_vm7, %v878_v40, %v1259_v27 }
 0x368   :  { %v976_v24 = vpop.xlane.xlu1 %975 }
 0x369   :  { %v983_v25 = vmul.f32 %v1702_v61, %v976_v24 }
 0x36b   :  { %985 = vrot.lane.b32.xlu1 %v983_v25, %s1729_s1  ;;  %v858_v25 = vand.u32 2147483647, %v857_v20 }
 0x36c   :  { %v972_v31 = vpop.xlane.xlu1 %971 }
 0x36d   :  { %v977_v16 = vmul.f32 %v1702_v61, %v972_v31  ;;  %v1258_v27 = vadd.f32 -0.5, %v858_v25  ;;  %vm859_vm14 = vcmp.le.f32.partialorder %v858_v25, 1.0 }
 0x36f   :  { %979 = vrot.lane.b32.xlu0 %v977_v16, %s1728_s2 }
 0x370   :  { %v1105_v36 = vpop.xlane.xlu1 %1104 }
 0x371   :  { %v1106_v29 = vmul.f32 %v1702_v61, %v1105_v36  ;;  %v860_v36 = vmul.f32 0.5, %v858_v25 }
 0x373   :  { %v1107_v43 = vsub.f32 %v2570_v52, %v1106_v29  ;;  %580 = vrot.lane.b32.xlu0 %v578_v39, %s1728_s2  ;;  %v861_v40 = vmul.f32 %v860_v36, %v858_v25 }
 0x375   :  { %v1108_v30 = vand.u32 2147483647, %v1107_v43 }
 0x377   :  { %882 = vrot.lane.b32.xlu0 %v880_v44, %s1729_s1  ;;  %v1110_v50 = vmul.f32 0.16666667, %v1108_v30  ;;  %v1262_v54 = vadd.f32 -1.5, %v1108_v30  ;;  %vm1109_vm9 = vcmp.le.f32.partialorder %v1108_v30, 3.0 }
 0x379   :  { %v1111_v51 = vmul.f32 %v1110_v50, %v1108_v30 }
 0x37b   :  { %478 = vrot.lane.b32.xlu0 %v476_v55, %s1729_s1  ;;  %v1113_v56 = vsel %vm1109_vm9, %v1111_v51, %v1262_v54 }
 0x37f   :  { %1115 = vrot.lane.b32.xlu0 %v1113_v56, %s1728_s2 }
 0x38f   :  { %328 = vadd.xlane.f32.xlu1 %v327_v58 }
 0x3a0   :  { %443 = vrot.lane.b32.xlu1 %v441_v59, %s1728_s2  ;;  %s1142_s2 = sshll.u32 %s1730_s22, 4  ;;  %s1143_s2 = int_to_ptr.vmem [resolvable:$true] %s1142_s2 }
 0x3a1   :  { %s1703_s23 = scalar_lea.vmem %s1143_s2, 32  ;;  %p1708_p1 = scmp.lt.s32.totalorder %s1143_s2, %s1143_s2 }
 0x3a2   :  { %p1704_p0 = scmp.ne.s32.totalorder %s1143_s2, %s1703_s23  ;;  %p1709_p2 = scmp.lt.s32.totalorder %s1703_s23, %s1703_s23 }
 0x3a4   :  { %p1710_p3 = por %p1709_p2, %p1708_p1 }
 0x3a6   :  { %p1711_p4 = pnand %p1710_p3, %p1704_p0 }
 0x3c4   :  { %349 = vadd.xlane.f32.xlu1 %v348_v18 }
 0x3dd   :  { %v986_v61 = vpop.permute.xlu1 %985 }
 0x3de   :  { %v988_v0 = vadd.f32 %v986_v61, %v856_v19 }
 0x3e0   :  { %v1006_v1 = vsub.f32 %v2570_v52, %v988_v0 }
 0x3e1   :  { %v980_v3 = vpop.permute.xlu0 %979 }
 0x3e2   :  { %v1007_v4 = vand.u32 2147483647, %v1006_v1  ;;  %v982_v22 = vadd.f32 %v980_v3, %v852_v15 }
 0x3e4   :  { %v1009_v5 = vmul.f32 0.5, %v1007_v4  ;;  %v1261_v11 = vadd.f32 -0.5, %v1007_v4  ;;  %vm1008_vm12 = vcmp.le.f32.partialorder %v1007_v4, 1.0  ;;  %v989_v63 = vsub.f32 %v2570_v52, %v982_v22 }
 0x3e5   :  { %v581_v7 = vpop.permute.xlu0 %580 }
 0x3e6   :  { %v583_v9 = vsel %vm326_vm11, %v581_v7, 0.0  ;;  %v1010_v10 = vmul.f32 %v1009_v5, %v1007_v4  ;;  %v990_v34 = vand.u32 2147483647, %v989_v63 }
 0x3e7   :  { %584 = vadd.xlane.f32.xlu0 %v583_v9 }
 0x3e8   :  { %v1012_v42 = vsel %vm1008_vm12, %v1010_v10, %v1261_v11  ;;  %v992_v37 = vmul.f32 0.5, %v990_v34  ;;  %v1260_v44 = vadd.f32 -0.5, %v990_v34  ;;  %vm991_vm15 = vcmp.le.f32.partialorder %v990_v34, 1.0 }
 0x3e9   :  { %v883_v47 = vpop.permute.xlu0 %882  ;;  %1014 = vrot.lane.b32.xlu1 %v1012_v42, %s1729_s1 }
 0x3ea   :  { %v885_v12 = vsel %vm326_vm11, %v883_v47, 0.0  ;;  %v993_v30 = vmul.f32 %v992_v37, %v990_v34 }
 0x3eb   :  { %886 = vadd.xlane.f32.xlu0 %v885_v12 }
 0x3ed   :  { %v479_v13 = vpop.permute.xlu0 %478 }
 0x3ee   :  { %v481_v14 = vsel %vm326_vm11, %v479_v13, 0.0 }
 0x3ef   :  { %482 = vadd.xlane.f32.xlu0 %v481_v14 }
 0x3f1   :  { %v1116_v46 = vpop.permute.xlu0 %1115 }
 0x3f2   :  { %v1118_v55 = vsel %vm326_vm11, %v1116_v46, 0.0 }
 0x41c   :  { %v329_v19 = vpop.xlane.xlu1 %328 }
 0x41d   :  { %v330_v62 = vrot.slane %v329_v19, 4 }
 0x41f   :  { %v331_v23 = vadd.f32 %v330_v62, %v329_v19 }
 0x420   :  { %v444_v24 = vpop.permute.xlu1 %443 }
 0x421   :  { %v332_v8 = vrot.slane %v331_v23, 2  ;;  %v446_v28 = vadd.f32 %v444_v24, %v314_v45  ;;  %v995_v45 = vsel %vm991_vm15, %v993_v30, %v1260_v44 }
 0x422   :  { %v996_v50 = vsel %vm326_vm11, %v995_v45, 0.0 }
 0x423   :  { %v453_v31 = vsub.f32 %v2552_v2, %v446_v28  ;;  %v333_v16 = vadd.f32 %v332_v8, %v331_v23  ;;  %v863_v2 = vsel %vm859_vm14, %v861_v40, %v1258_v27 }
 0x424   :  { %v864_v41 = vsel %vm326_vm11, %v863_v2, 0.0 }
 0x425   :  { %v454_v21 = vand.u32 2147483647, %v453_v31  ;;  %v334_v35 = vrot.slane %v333_v16, 1 }
 0x427   :  { %v335_v32 = vadd.f32 %v334_v35, %v333_v16  ;;  %v456_v38 = vmul.f32 0.5, %v454_v21  ;;  %v1158_v39 = vadd.f32 -0.5, %v454_v21  ;;  %vm455_vm13 = vcmp.le.f32.partialorder %v454_v21, 1.0 }
 0x429   :  { %1665 = vpush %v335_v32  ;;  %v457_v29 = vmul.f32 %v456_v38, %v454_v21 }
 0x42b   :  { %v459_v43 = vsel %vm455_vm13, %v457_v29, %v1158_v39 }
 0x42c   :  { %v460_v52 = vsel %vm326_vm11, %v459_v43, 0.0 }
 0x42d   :  { %461 = vadd.xlane.f32.xlu1 %v460_v52 }
 0x431   :  { %865 = vadd.xlane.f32.xlu1 %v864_v41 }
 0x435   :  { %997 = vadd.xlane.f32.xlu1 %v996_v50 }
 0x439   :  { %1119 = vadd.xlane.f32.xlu1 %v1118_v55 }
 0x451   :  { %v350_v51 = vpop.xlane.xlu1 %349 }
 0x452   :  { %v351_v53 = vrot.slane %v350_v51, 4 }
 0x454   :  { %v352_v54 = vadd.f32 %v351_v53, %v350_v51 }
 0x456   :  { %v353_v56 = vrot.slane %v352_v54, 2 }
 0x458   :  { %v354_v6 = vadd.f32 %v353_v56, %v352_v54 }
 0x45a   :  { %v355_v57 = vrot.slane %v354_v6, 1  ;;  %s1666_s3 = spop %1665 }
 0x45b   :  { %v1015_v17 = vpop.permute.xlu1 %1014 }
 0x45c   :  { %v1017_v48 = vsel %vm326_vm11, %v1015_v17, 0.0  ;;  %v356_v49 = vadd.f32 %v355_v57, %v354_v6 }
 0x45d   :  { %1018 = vadd.xlane.f32.xlu0 %v1017_v48 }
 0x45e   :  { %1667 = vpush %v356_v49 }
 0x474   :  { %v585_v58 = vpop.xlane.xlu0 %584 }
 0x475   :  { %v586_v33 = vrot.slane %v585_v58, 4 }
 0x477   :  { %v587_v1 = vadd.f32 %v586_v33, %v585_v58 }
 0x478   :  { %v887_v59 = vpop.xlane.xlu0 %886 }
 0x479   :  { %v888_v61 = vrot.slane %v887_v59, 4  ;;  %v588_v7 = vrot.slane %v587_v1, 2 }
 0x47b   :  { %v889_v3 = vadd.f32 %v888_v61, %v887_v59  ;;  %v589_v14 = vadd.f32 %v588_v7, %v587_v1 }
 0x47c   :  { %v483_v60 = vpop.xlane.xlu0 %482 }
 0x47d   :  { %v484_v18 = vrot.slane %v483_v60, 4  ;;  %v890_v11 = vrot.slane %v889_v3, 2  ;;  %v590_v63 = vrot.slane %v589_v14, 1 }
 0x47f   :  { %v485_v0 = vadd.f32 %v484_v18, %v483_v60  ;;  %v891_v62 = vadd.f32 %v890_v11, %v889_v3  ;;  %v591_v35 = vadd.f32 %v590_v63, %v589_v14 }
 0x481   :  { %v486_v4 = vrot.slane %v485_v0, 2  ;;  %v892_v34 = vrot.slane %v891_v62, 1 }
 0x483   :  { %v487_v47 = vadd.f32 %v486_v4, %v485_v0  ;;  %v893_v29 = vadd.f32 %v892_v34, %v891_v62 }
 0x485   :  { %v488_v22 = vrot.slane %v487_v47, 1 }
 0x487   :  { %v489_v16 = vadd.f32 %v488_v22, %v487_v47 }
 0x48f   :  { %s1668_s27 = spop %1667 }
 0x490   :  { %s358_s28 = sadd.f32 %s1668_s27, %s1666_s3 }
 0x492   :  { %s361_s7 = smul.f32 0.0625, %s358_s28 }
 0x494   :  { %v598_v54 = vstv %s361_s7 }
 0x4ba   :  { %v462_v5 = vpop.xlane.xlu1 %461 }
 0x4bb   :  { %v463_v9 = vrot.slane %v462_v5, 4 }
 0x4bd   :  { %v464_v10 = vadd.f32 %v463_v9, %v462_v5 }
 0x4be   :  { %v866_v42 = vpop.xlane.xlu1 %865 }
 0x4bf   :  { %v465_v12 = vrot.slane %v464_v10, 2  ;;  %v867_v13 = vrot.slane %v866_v42, 4 }
 0x4c1   :  { %v868_v15 = vadd.f32 %v867_v13, %v866_v42  ;;  %v466_v19 = vadd.f32 %v465_v12, %v464_v10 }
 0x4c2   :  { %v998_v20 = vpop.xlane.xlu1 %997 }
 0x4c3   :  { %v869_v23 = vrot.slane %v868_v15, 2  ;;  %v999_v24 = vrot.slane %v998_v20, 4  ;;  %v467_v25 = vrot.slane %v466_v19, 1 }
 0x4c5   :  { %v1000_v8 = vadd.f32 %v999_v24, %v998_v20  ;;  %v468_v28 = vadd.f32 %v467_v25, %v466_v19  ;;  %v870_v31 = vadd.f32 %v869_v23, %v868_v15 }
 0x4c6   :  { %v1120_v37 = vpop.xlane.xlu1 %1119 }
 0x4c7   :  { %v1001_v21 = vrot.slane %v1000_v8, 2  ;;  %1669 = vpush %v468_v28  ;;  %v871_v36 = vrot.slane %v870_v31, 1  ;;  %v1121_v43 = vrot.slane %v1120_v37, 4 }
 0x4c8   :  { %1671 = vpush %v489_v16 }
 0x4c9   :  { %1673 = vpush %v591_v35  ;;  %v872_v32 = vadd.f32 %v871_v36, %v870_v31  ;;  %v1002_v38 = vadd.f32 %v1001_v21, %v1000_v8  ;;  %v1122_v27 = vadd.f32 %v1121_v43, %v1120_v37 }
 0x4cb   :  { %1675 = vpush %v872_v32  ;;  %v1003_v39 = vrot.slane %v1002_v38, 1  ;;  %v1123_v52 = vrot.slane %v1122_v27, 2 }
 0x4cc   :  { %1677 = vpush %v893_v29 }
 0x4cd   :  { %v1004_v40 = vadd.f32 %v1003_v39, %v1002_v38  ;;  %v1124_v41 = vadd.f32 %v1123_v52, %v1122_v27 }
 0x4cf   :  { %1679 = vpush %v1004_v40  ;;  %v1125_v46 = vrot.slane %v1124_v41, 1 }
 0x4d1   :  { %v1126_v53 = vadd.f32 %v1125_v46, %v1124_v41 }
 0x4ea   :  { %v1019_v2 = vpop.xlane.xlu0 %1018 }
 0x4eb   :  { %v1020_v30 = vrot.slane %v1019_v2, 4 }
 0x4ed   :  { %v1021_v44 = vadd.f32 %v1020_v30, %v1019_v2 }
 0x4ef   :  { %v1022_v45 = vrot.slane %v1021_v44, 2 }
 0x4f1   :  { %v1023_v50 = vadd.f32 %v1022_v45, %v1021_v44 }
 0x4f3   :  { %v1024_v55 = vrot.slane %v1023_v50, 1 }
 0x4f5   :  { %v1025_v51 = vadd.f32 %v1024_v55, %v1023_v50 }
 0x4f7   :  { %1681 = vpush %v1025_v51 }
 0x4f8   :  { %1683 = vpush %v1126_v53  ;;  %s1670_s29 = spop %1669 }
 0x4f9   :  { %s1672_s30 = spop %1671 }
 0x4fa   :  { %s491_s0 = sadd.f32 %s1672_s30, %s1670_s29  ;;  %s1674_s6 = spop %1673 }
 0x4fb   :  { %s595_s9 = smul.f32 0.125, %s1674_s6 }
 0x4fc   :  { %s494_s8 = smul.f32 0.0625, %s491_s0  ;;  %s1676_s12 = spop %1675 }
 0x4fd   :  { %s1678_s13 = spop %1677 }
 0x4fe   :  { %s495_s10 = smul.f32 0.1, %s494_s8  ;;  %s895_s14 = sadd.f32 %s1678_s13, %s1676_s12 }
 0x500   :  { %s596_s11 = sadd.f32 %s595_s9, %s495_s10  ;;  %s1680_s4 = spop %1679 }
 0x501   :  { %s898_s18 = smul.f32 0.0625, %s895_s14 }
 0x502   :  { %v599_v56 = vstv %s596_s11 }
 0x503   :  { %v600_v6 = vsel %vm597_vm0, %v598_v54, %v599_v56  ;;  %v1132_v57 = vstv %s898_s18 }
 0x504   :  { %601 = vst [vmem:[#allocation2] sm:$0x1] %v600_v6 }
 0x528   :  { %s1682_s15 = spop %1681 }
 0x529   :  { %s1027_s16 = sadd.f32 %s1682_s15, %s1680_s4  ;;  %s1684_s17 = spop %1683 }
 0x52a   :  { %s1130_s20 = smul.f32 0.125, %s1684_s17 }
 0x52b   :  { %s1030_s19 = smul.f32 0.0625, %s1027_s16 }
 0x52d   :  { %s1031_s21 = smul.f32 0.1, %s1030_s19 }
 0x52f   :  { %s1131_s1 = sadd.f32 %s1130_s20, %s1031_s21 }
 0x531   :  { %v1133_v17 = vstv %s1131_s1 }
 0x532   :  { %v1134_v48 = vsel %vm597_vm0, %v1132_v57, %v1133_v17 }
 0x533   :  { %1136 = vst [vmem:[#allocation2 + $0x1] sm:$0x1] %v1134_v48 }
 0x534   :  { %1714 = shalt.err (!%p1711_p4)
}
 0x535   :  { %s1715_s26 = scalar_lea.hbm %s2625_s5, 32 }
 0x536   :  { %p1716_p5 = scmp.ne.s32.totalorder %s2625_s5, %s1715_s26  ;;  %p1719_p6 = scmp.lt.u32.totalorder %s1715_s26, %s2625_s5 }
 0x538   :  { %p1721_p7 = pnand %p1719_p6, %p1716_p5 }
 0x53a   :  { %1724 = shalt.err (!%p1721_p7)
}
 0x53b   :  { %s1731_s30 = smov 16   ;;  %s1732_s0 = smov 1  }
 0x53c   :  { %1148 = dma.vmem_to_hbm [thread:$0]  %s1143_s2, 32, %s2625_s5, [#allocation3], %s1731_s30, %s1731_s30, %s1732_s0  }
 0x53d   :  { %1725 = dma.done.wait [#allocation3], 32  }
 0x53e   :  { %1726 = vsyncadd [#allocation3], 4294967264 }
 0x53f   :  { %1152 = vsyncpa [#allocation3], 1 }

</bundles_post_ra>
